<compile_context>
chip_gen: v7x
topology: tpu7x:2x2x1
jax: 0.10.0
libtpu: 0.0.40
codegen_flags: <defaults>
</compile_context>

<pallas_src>
import math

import jax
import jax.numpy as jnp
from jax.experimental import pallas as pl
from jax.experimental.pallas import tpu as pltpu

# ----------------------------- model hyper-params -----------------------------
B = 2          # batch
S = 8          # sequence length
D = 32         # d_model (layer.size)
H = 4          # attention heads
DH = D // H    # head dim
DFF = 64       # feed-forward hidden dim
N_LAYERS = 2   # number of encoder layers
LN_EPS = 1e-5  # nn.LayerNorm default eps
NEG_INF = -1e9


def _layer_norm(x, gamma, beta):
    """nn.LayerNorm over the last axis (biased variance, eps=1e-5)."""
    mu = jnp.mean(x, axis=-1, keepdims=True)
    var = jnp.mean((x - mu) ** 2, axis=-1, keepdims=True)
    return (x - mu) * jax.lax.rsqrt(var + LN_EPS) * gamma + beta


# ------------------------------ Pallas kernel ---------------------------------
def encoder_kernel(x_ref, mask_ref, wqkv_ref, wo_ref, w1_ref, w2_ref,
                   bcat_ref, vecs_ref, fnorm_ref, o_ref):
    """Whole encoder (all layers + final LayerNorm) in a single grid step."""
    scale = 1.0 / math.sqrt(DH)

    # Fold (B, S) into the matmul M-dim; leading-dim collapse only (no relayout).
    x = x_ref[...].astype(jnp.float32).reshape(B * S, D)            # (16, 32)

    # Additive key-padding mask bias (0 = attend, -1e9 = masked), computed once.
    # Fused batch/head index n = h * B + b  ->  tile the per-batch bias H times.
    bias = jnp.where(mask_ref[...] == 0.0, NEG_INF, 0.0)            # (B, 1, S)
    bias = jnp.tile(bias, (H, 1, 1))                                # (H*B, 1, S)

    # Static unroll over layers; stacked weights stay resident in VMEM.
    for l in range(N_LAYERS):
        vec = vecs_ref[l]                                            # (6, D)
        ln1_g, ln1_b, bo = vec[0:1, :], vec[1:2, :], vec[2:3, :]
        ln2_g, ln2_b, b2 = vec[3:4, :], vec[4:5, :], vec[5:6, :]
        bvec = bcat_ref[l]                                           # (1, 3D+DFF)
        bqkv, b1 = bvec[:, :3 * D], bvec[:, 3 * D:]

        # ---- sublayer 1: x + self_attn(LayerNorm(x)) ----
        xn = _layer_norm(x, ln1_g, ln1_b)                            # (16, 32)
        qkv = jnp.dot(xn, wqkv_ref[l],
                      preferred_element_type=jnp.float32) + bqkv     # (16, 96)

        def split_heads(base):
            # (H*B, S, DH) with fused index n = h*B + b (static slices + stack only)
            return jnp.stack(
                [qkv[b * S:(b + 1) * S, base + h * DH: base + (h + 1) * DH]
                 for h in range(H) for b in range(B)], axis=0)

        q, k, v = split_heads(0), split_heads(D), split_heads(2 * D)

        s = jnp.einsum('nqe,nke->nqk', q, k,
                       preferred_element_type=jnp.float32) * scale + bias  # (H*B, S, S)
        s_max = jnp.max(s, axis=-1, keepdims=True)
        p = jnp.exp(s - s_max)
        p = p * pl.reciprocal(jnp.sum(p, axis=-1, keepdims=True), approx=True)

        ctx = jnp.einsum('nqk,nke->nqe', p, v,
                         preferred_element_type=jnp.float32)          # (H*B, S, DH)
        # Heads back along lanes, batches along sublanes -> (B*S, D).
        ctx2d = jnp.concatenate(
            [jnp.concatenate([ctx[h * B + b] for h in range(H)], axis=1)
             for b in range(B)], axis=0)
        # Output projection fused with the head reduction: one (16,32)@(32,32) matmul.
        x = x + jnp.dot(ctx2d, wo_ref[l],
                        preferred_element_type=jnp.float32) + bo      # dropout = identity

        # ---- sublayer 2: x + FFN(LayerNorm(x)) ----
        xn2 = _layer_norm(x, ln2_g, ln2_b)
        h1 = jnp.maximum(
            jnp.dot(xn2, w1_ref[l], preferred_element_type=jnp.float32) + b1, 0.0)
        x = x + jnp.dot(h1, w2_ref[l], preferred_element_type=jnp.float32) + b2

    # final Encoder.norm (nn.LayerNorm)
    fn = fnorm_ref[...]                                               # (2, D)
    out = _layer_norm(x, fn[0:1, :], fn[1:2, :])                      # (16, 32)
    # TODO(synk): a 128-lane-dense (B, S*D) output would need a sublane->lane reshape
    # in-kernel; at 2 KiB total output the store cost is negligible, so keep (B,S,D).
    o_ref[...] = out.reshape(B, S, D).astype(o_ref.dtype)


# ------------------------------ Python wrapper ---------------------------------
def _whole_block(a):
    """Whole-array block for the single grid step."""
    return pl.BlockSpec(a.shape, lambda i, _nd=a.ndim: (0,) * _nd)


@jax.jit
def encoder_forward(x, mask, params):
    args = (x, mask, params['wqkv'], params['wo'], params['w1'], params['w2'],
            params['bcat'], params['vecs'], params['fnorm'])
    return pl.pallas_call(
        encoder_kernel,
        out_shape=jax.ShapeDtypeStruct((B, S, D), x.dtype),
        grid=(1,),
        in_specs=[_whole_block(a) for a in args],
        out_specs=pl.BlockSpec((B, S, D), lambda i: (0, 0, 0)),
        compiler_params=pltpu.CompilerParams(dimension_semantics=("arbitrary",)),
    )(*args)


# ------------------------------ parameter setup --------------------------------
def init_layer_params(key):
    ks = jax.random.split(key, 6)
    scale = 0.05
    return dict(
        wq=scale * jax.random.normal(ks[0], (D, D), jnp.float32),
        bq=jnp.zeros((D,), jnp.float32),
        wk=scale * jax.random.normal(ks[1], (D, D), jnp.float32),
        bk=jnp.zeros((D,), jnp.float32),
        wv=scale * jax.random.normal(ks[2], (D, D), jnp.float32),
        bv=jnp.zeros((D,), jnp.float32),
        wo=scale * jax.random.normal(ks[3], (D, D), jnp.float32),
        bo=jnp.zeros((D,), jnp.float32),
        ln1_g=jnp.ones((D,), jnp.float32),
        ln1_b=jnp.zeros((D,), jnp.float32),
        w1=scale * jax.random.normal(ks[4], (D, DFF), jnp.float32),
        b1=jnp.zeros((DFF,), jnp.float32),
        w2=scale * jax.random.normal(ks[5], (DFF, D), jnp.float32),
        b2=jnp.zeros((D,), jnp.float32),
        ln2_g=jnp.ones((D,), jnp.float32),
        ln2_b=jnp.zeros((D,), jnp.float32),
    )


def prepare_params(layer_params, norm_gamma, norm_beta):
    """Pack per-layer tensors wrapper-side:
       - Q/K/V weights concatenated to (L, D, 3D); their biases + FFN b1 to (L, 1, 3D+DFF)
       - the six D-wide vectors (ln1_g, ln1_b, bo, ln2_g, ln2_b, b2) to (L, 6, D)
       - final norm gamma/beta to (2, D)
       All reshapes/concats happen once, outside the kernel."""
    def stk(fn):
        return jnp.stack([fn(p) for p in layer_params], axis=0)

    return dict(
        wqkv=stk(lambda p: jnp.concatenate([p['wq'], p['wk'], p['wv']], axis=1)),   # (L, D, 3D)
        wo=stk(lambda p: p['wo']),                                                  # (L, D, D)
        w1=stk(lambda p: p['w1']),                                                  # (L, D, DFF)
        w2=stk(lambda p: p['w2']),                                                  # (L, DFF, D)
        bcat=stk(lambda p: jnp.concatenate(
            [p['bq'], p['bk'], p['bv'], p['b1']])[None, :]),                        # (L, 1, 3D+DFF)
        vecs=stk(lambda p: jnp.stack(
            [p['ln1_g'], p['ln1_b'], p['bo'],
             p['ln2_g'], p['ln2_b'], p['b2']], axis=0)),                            # (L, 6, D)
        fnorm=jnp.stack([norm_gamma, norm_beta], axis=0),                           # (2, D)
    )


if __name__ == "__main__":
    key = jax.random.PRNGKey(0)
    k_x, k_layers = jax.random.split(key)

    x = jax.random.normal(k_x, (B, S, D), jnp.float32)
    # mask: attend to first 6 positions of each sequence (1 = keep, 0 = masked)
    mask = (jnp.arange(S)[None, None, :] < 6).astype(jnp.float32)   # (1, 1, S)
    mask = jnp.broadcast_to(mask, (B, 1, S))

    layer_keys = jax.random.split(k_layers, N_LAYERS)
    # clones() deep-copies one layer, so all N layers share identical initial weights;
    # mirror that by reusing the same key for every layer.
    layer_params = [init_layer_params(layer_keys[0]) for _ in range(N_LAYERS)]
    params = prepare_params(layer_params,
                            jnp.ones((D,), jnp.float32),
                            jnp.zeros((D,), jnp.float32))

    # TODO(synk): training-mode dropout has no role in this eval-mode forward (identity).
    out = encoder_forward(x, mask, params)
    out = jax.block_until_ready(out)

    assert out.shape == (B, S, D)
    assert bool(jnp.all(jnp.isfinite(out)))
    print("KERNEL_OK")
</pallas_src>

<mosaic_0001>
module attributes {stable_mosaic.version = 11 : i64} {
  func.func @encoder_kernel(%arg0: i32, %arg1: memref<2x8x32xf32, #tpu.memory_space<vmem>>, %arg2: memref<2x1x8xf32, #tpu.memory_space<vmem>>, %arg3: memref<2x32x96xf32, #tpu.memory_space<vmem>>, %arg4: memref<2x32x32xf32, #tpu.memory_space<vmem>>, %arg5: memref<2x32x64xf32, #tpu.memory_space<vmem>>, %arg6: memref<2x64x32xf32, #tpu.memory_space<vmem>>, %arg7: memref<2x1x160xf32, #tpu.memory_space<vmem>>, %arg8: memref<2x6x32xf32, #tpu.memory_space<vmem>>, %arg9: memref<2x32xf32, #tpu.memory_space<vmem>>, %arg10: memref<2x8x32xf32, #tpu.memory_space<vmem>>) attributes {dimension_semantics = [#tpu.dimension_semantics<arbitrary>], iteration_bounds = array<i64: 1>, scalar_prefetch = 0 : i64, scratch_operands = 0 : i64, tpu.core_type = #tpu.core_type<tc>, window_params = [{pipeline_mode = #tpu.pipeline_mode<synchronous>, transform_indices = @transform_0, window_bounds = array<i64: 2, 8, 32>}, {pipeline_mode = #tpu.pipeline_mode<synchronous>, transform_indices = @transform_1, window_bounds = array<i64: 2, 1, 8>}, {pipeline_mode = #tpu.pipeline_mode<synchronous>, transform_indices = @transform_2, window_bounds = array<i64: 2, 32, 96>}, {pipeline_mode = #tpu.pipeline_mode<synchronous>, transform_indices = @transform_3, window_bounds = array<i64: 2, 32, 32>}, {pipeline_mode = #tpu.pipeline_mode<synchronous>, transform_indices = @transform_4, window_bounds = array<i64: 2, 32, 64>}, {pipeline_mode = #tpu.pipeline_mode<synchronous>, transform_indices = @transform_5, window_bounds = array<i64: 2, 64, 32>}, {pipeline_mode = #tpu.pipeline_mode<synchronous>, transform_indices = @transform_6, window_bounds = array<i64: 2, 1, 160>}, {pipeline_mode = #tpu.pipeline_mode<synchronous>, transform_indices = @transform_7, window_bounds = array<i64: 2, 6, 32>}, {pipeline_mode = #tpu.pipeline_mode<synchronous>, transform_indices = @transform_8, window_bounds = array<i64: 2, 32>}, {pipeline_mode = #tpu.pipeline_mode<synchronous>, transform_indices = @transform_9, window_bounds = array<i64: 2, 8, 32>}]} {
    %c0 = arith.constant 0 : index
    %c0_0 = arith.constant 0 : index
    %c0_1 = arith.constant 0 : index
    %0 = vector.load %arg1[%c0, %c0_0, %c0_1] : memref<2x8x32xf32, #tpu.memory_space<vmem>>, vector<2x8x32xf32>
    %1 = vector.shape_cast %0 : vector<2x8x32xf32> to vector<16x32xf32>
    %c0_2 = arith.constant 0 : index
    %c0_3 = arith.constant 0 : index
    %c0_4 = arith.constant 0 : index
    %2 = vector.load %arg2[%c0_2, %c0_3, %c0_4] : memref<2x1x8xf32, #tpu.memory_space<vmem>>, vector<2x1x8xf32>
    %cst = arith.constant 0.000000e+00 : f32
    %3 = vector.broadcast %cst : f32 to vector<2x1x8xf32>
    %4 = arith.cmpf oeq, %2, %3 : vector<2x1x8xf32>
    %cst_5 = arith.constant -1.000000e+09 : f32
    %cst_6 = arith.constant 0.000000e+00 : f32
    %5 = vector.broadcast %cst_5 : f32 to vector<2x1x8xf32>
    %6 = vector.broadcast %cst_6 : f32 to vector<2x1x8xf32>
    %7 = arith.select %4, %5, %6 : vector<2x1x8xi1>, vector<2x1x8xf32>
    %8 = tpu.concatenate %7, %7, %7, %7 in 0 : vector<2x1x8xf32>, vector<2x1x8xf32>, vector<2x1x8xf32>, vector<2x1x8xf32> -> vector<8x1x8xf32>
    %c0_7 = arith.constant 0 : index
    %c0_8 = arith.constant 0 : index
    %c0_9 = arith.constant 0 : index
    %9 = vector.load %arg8[%c0_7, %c0_8, %c0_9] : memref<2x6x32xf32, #tpu.memory_space<vmem>>, vector<1x6x32xf32>
    %10 = vector.shape_cast %9 : vector<1x6x32xf32> to vector<6x32xf32>
    %11 = vector.extract_strided_slice %10 {offsets = [0, 0], sizes = [1, 32], strides = [1, 1]} : vector<6x32xf32> to vector<1x32xf32>
    %12 = vector.extract_strided_slice %10 {offsets = [1, 0], sizes = [1, 32], strides = [1, 1]} : vector<6x32xf32> to vector<1x32xf32>
    %13 = vector.extract_strided_slice %10 {offsets = [2, 0], sizes = [1, 32], strides = [1, 1]} : vector<6x32xf32> to vector<1x32xf32>
    %14 = vector.extract_strided_slice %10 {offsets = [3, 0], sizes = [1, 32], strides = [1, 1]} : vector<6x32xf32> to vector<1x32xf32>
    %15 = vector.extract_strided_slice %10 {offsets = [4, 0], sizes = [1, 32], strides = [1, 1]} : vector<6x32xf32> to vector<1x32xf32>
    %16 = vector.extract_strided_slice %10 {offsets = [5, 0], sizes = [1, 32], strides = [1, 1]} : vector<6x32xf32> to vector<1x32xf32>
    %c0_10 = arith.constant 0 : index
    %c0_11 = arith.constant 0 : index
    %c0_12 = arith.constant 0 : index
    %17 = vector.load %arg7[%c0_10, %c0_11, %c0_12] : memref<2x1x160xf32, #tpu.memory_space<vmem>>, vector<1x1x160xf32>
    %18 = vector.shape_cast %17 : vector<1x1x160xf32> to vector<1x160xf32>
    %19 = vector.extract_strided_slice %18 {offsets = [0, 0], sizes = [1, 96], strides = [1, 1]} : vector<1x160xf32> to vector<1x96xf32>
    %20 = vector.extract_strided_slice %18 {offsets = [0, 96], sizes = [1, 64], strides = [1, 1]} : vector<1x160xf32> to vector<1x64xf32>
    %cst_13 = arith.constant dense<0.000000e+00> : vector<16xf32>
    %21 = vector.multi_reduction <add>, %1, %cst_13 [1] : vector<16x32xf32> to vector<16xf32>
    %22 = vector.shape_cast %21 : vector<16xf32> to vector<16x1xf32>
    %cst_14 = arith.constant 3.200000e+01 : f32
    %23 = vector.broadcast %cst_14 : f32 to vector<16x1xf32>
    %24 = arith.divf %22, %23 : vector<16x1xf32>
    %25 = vector.broadcast %24 : vector<16x1xf32> to vector<16x32xf32>
    %26 = arith.subf %1, %25 : vector<16x32xf32>
    %27 = arith.mulf %26, %26 : vector<16x32xf32>
    %cst_15 = arith.constant dense<0.000000e+00> : vector<16xf32>
    %28 = vector.multi_reduction <add>, %27, %cst_15 [1] : vector<16x32xf32> to vector<16xf32>
    %29 = vector.shape_cast %28 : vector<16xf32> to vector<16x1xf32>
    %cst_16 = arith.constant 3.200000e+01 : f32
    %30 = vector.broadcast %cst_16 : f32 to vector<16x1xf32>
    %31 = arith.divf %29, %30 : vector<16x1xf32>
    %32 = vector.broadcast %24 : vector<16x1xf32> to vector<16x32xf32>
    %33 = arith.subf %1, %32 : vector<16x32xf32>
    %cst_17 = arith.constant 9.99999974E-6 : f32
    %34 = vector.broadcast %cst_17 : f32 to vector<16x1xf32>
    %35 = arith.addf %31, %34 : vector<16x1xf32>
    %36 = math.rsqrt %35 : vector<16x1xf32>
    %37 = vector.broadcast %36 : vector<16x1xf32> to vector<16x32xf32>
    %38 = arith.mulf %33, %37 : vector<16x32xf32>
    %39 = vector.broadcast %11 : vector<1x32xf32> to vector<16x32xf32>
    %40 = arith.mulf %38, %39 : vector<16x32xf32>
    %41 = vector.broadcast %12 : vector<1x32xf32> to vector<16x32xf32>
    %42 = arith.addf %40, %41 : vector<16x32xf32>
    %c0_18 = arith.constant 0 : index
    %c0_19 = arith.constant 0 : index
    %c0_20 = arith.constant 0 : index
    %43 = vector.load %arg3[%c0_18, %c0_19, %c0_20] : memref<2x32x96xf32, #tpu.memory_space<vmem>>, vector<1x32x96xf32>
    %44 = vector.shape_cast %43 : vector<1x32x96xf32> to vector<32x96xf32>
    %cst_21 = arith.constant dense<0.000000e+00> : vector<16x96xf32>
    %45 = tpu.matmul %42, %44, %cst_21 {dimension_numbers = #tpu.dot_dimension_numbers<[1], [0], [0], [1], [0, 0, 1, 1], [], []>} : vector<16x32xf32>, vector<32x96xf32>, vector<16x96xf32> -> vector<16x96xf32>
    %46 = vector.broadcast %19 : vector<1x96xf32> to vector<16x96xf32>
    %47 = arith.addf %45, %46 : vector<16x96xf32>
    %48 = vector.extract_strided_slice %47 {offsets = [0, 0], sizes = [8, 8], strides = [1, 1]} : vector<16x96xf32> to vector<8x8xf32>
    %49 = vector.extract_strided_slice %47 {offsets = [8, 0], sizes = [8, 8], strides = [1, 1]} : vector<16x96xf32> to vector<8x8xf32>
    %50 = vector.extract_strided_slice %47 {offsets = [0, 8], sizes = [8, 8], strides = [1, 1]} : vector<16x96xf32> to vector<8x8xf32>
    %51 = vector.extract_strided_slice %47 {offsets = [8, 8], sizes = [8, 8], strides = [1, 1]} : vector<16x96xf32> to vector<8x8xf32>
    %52 = vector.extract_strided_slice %47 {offsets = [0, 16], sizes = [8, 8], strides = [1, 1]} : vector<16x96xf32> to vector<8x8xf32>
    %53 = vector.extract_strided_slice %47 {offsets = [8, 16], sizes = [8, 8], strides = [1, 1]} : vector<16x96xf32> to vector<8x8xf32>
    %54 = vector.extract_strided_slice %47 {offsets = [0, 24], sizes = [8, 8], strides = [1, 1]} : vector<16x96xf32> to vector<8x8xf32>
    %55 = vector.extract_strided_slice %47 {offsets = [8, 24], sizes = [8, 8], strides = [1, 1]} : vector<16x96xf32> to vector<8x8xf32>
    %56 = vector.shape_cast %48 : vector<8x8xf32> to vector<1x8x8xf32>
    %57 = vector.shape_cast %49 : vector<8x8xf32> to vector<1x8x8xf32>
    %58 = vector.shape_cast %50 : vector<8x8xf32> to vector<1x8x8xf32>
    %59 = vector.shape_cast %51 : vector<8x8xf32> to vector<1x8x8xf32>
    %60 = vector.shape_cast %52 : vector<8x8xf32> to vector<1x8x8xf32>
    %61 = vector.shape_cast %53 : vector<8x8xf32> to vector<1x8x8xf32>
    %62 = vector.shape_cast %54 : vector<8x8xf32> to vector<1x8x8xf32>
    %63 = vector.shape_cast %55 : vector<8x8xf32> to vector<1x8x8xf32>
    %64 = tpu.concatenate %56, %57, %58, %59, %60, %61, %62, %63 in 0 : vector<1x8x8xf32>, vector<1x8x8xf32>, vector<1x8x8xf32>, vector<1x8x8xf32>, vector<1x8x8xf32>, vector<1x8x8xf32>, vector<1x8x8xf32>, vector<1x8x8xf32> -> vector<8x8x8xf32>
    %65 = vector.extract_strided_slice %47 {offsets = [0, 32], sizes = [8, 8], strides = [1, 1]} : vector<16x96xf32> to vector<8x8xf32>
    %66 = vector.extract_strided_slice %47 {offsets = [8, 32], sizes = [8, 8], strides = [1, 1]} : vector<16x96xf32> to vector<8x8xf32>
    %67 = vector.extract_strided_slice %47 {offsets = [0, 40], sizes = [8, 8], strides = [1, 1]} : vector<16x96xf32> to vector<8x8xf32>
    %68 = vector.extract_strided_slice %47 {offsets = [8, 40], sizes = [8, 8], strides = [1, 1]} : vector<16x96xf32> to vector<8x8xf32>
    %69 = vector.extract_strided_slice %47 {offsets = [0, 48], sizes = [8, 8], strides = [1, 1]} : vector<16x96xf32> to vector<8x8xf32>
    %70 = vector.extract_strided_slice %47 {offsets = [8, 48], sizes = [8, 8], strides = [1, 1]} : vector<16x96xf32> to vector<8x8xf32>
    %71 = vector.extract_strided_slice %47 {offsets = [0, 56], sizes = [8, 8], strides = [1, 1]} : vector<16x96xf32> to vector<8x8xf32>
    %72 = vector.extract_strided_slice %47 {offsets = [8, 56], sizes = [8, 8], strides = [1, 1]} : vector<16x96xf32> to vector<8x8xf32>
    %73 = vector.shape_cast %65 : vector<8x8xf32> to vector<1x8x8xf32>
    %74 = vector.shape_cast %66 : vector<8x8xf32> to vector<1x8x8xf32>
    %75 = vector.shape_cast %67 : vector<8x8xf32> to vector<1x8x8xf32>
    %76 = vector.shape_cast %68 : vector<8x8xf32> to vector<1x8x8xf32>
    %77 = vector.shape_cast %69 : vector<8x8xf32> to vector<1x8x8xf32>
    %78 = vector.shape_cast %70 : vector<8x8xf32> to vector<1x8x8xf32>
    %79 = vector.shape_cast %71 : vector<8x8xf32> to vector<1x8x8xf32>
    %80 = vector.shape_cast %72 : vector<8x8xf32> to vector<1x8x8xf32>
    %81 = tpu.concatenate %73, %74, %75, %76, %77, %78, %79, %80 in 0 : vector<1x8x8xf32>, vector<1x8x8xf32>, vector<1x8x8xf32>, vector<1x8x8xf32>, vector<1x8x8xf32>, vector<1x8x8xf32>, vector<1x8x8xf32>, vector<1x8x8xf32> -> vector<8x8x8xf32>
    %82 = vector.extract_strided_slice %47 {offsets = [0, 64], sizes = [8, 8], strides = [1, 1]} : vector<16x96xf32> to vector<8x8xf32>
    %83 = vector.extract_strided_slice %47 {offsets = [8, 64], sizes = [8, 8], strides = [1, 1]} : vector<16x96xf32> to vector<8x8xf32>
    %84 = vector.extract_strided_slice %47 {offsets = [0, 72], sizes = [8, 8], strides = [1, 1]} : vector<16x96xf32> to vector<8x8xf32>
    %85 = vector.extract_strided_slice %47 {offsets = [8, 72], sizes = [8, 8], strides = [1, 1]} : vector<16x96xf32> to vector<8x8xf32>
    %86 = vector.extract_strided_slice %47 {offsets = [0, 80], sizes = [8, 8], strides = [1, 1]} : vector<16x96xf32> to vector<8x8xf32>
    %87 = vector.extract_strided_slice %47 {offsets = [8, 80], sizes = [8, 8], strides = [1, 1]} : vector<16x96xf32> to vector<8x8xf32>
    %88 = vector.extract_strided_slice %47 {offsets = [0, 88], sizes = [8, 8], strides = [1, 1]} : vector<16x96xf32> to vector<8x8xf32>
    %89 = vector.extract_strided_slice %47 {offsets = [8, 88], sizes = [8, 8], strides = [1, 1]} : vector<16x96xf32> to vector<8x8xf32>
    %90 = vector.shape_cast %82 : vector<8x8xf32> to vector<1x8x8xf32>
    %91 = vector.shape_cast %83 : vector<8x8xf32> to vector<1x8x8xf32>
    %92 = vector.shape_cast %84 : vector<8x8xf32> to vector<1x8x8xf32>
    %93 = vector.shape_cast %85 : vector<8x8xf32> to vector<1x8x8xf32>
    %94 = vector.shape_cast %86 : vector<8x8xf32> to vector<1x8x8xf32>
    %95 = vector.shape_cast %87 : vector<8x8xf32> to vector<1x8x8xf32>
    %96 = vector.shape_cast %88 : vector<8x8xf32> to vector<1x8x8xf32>
    %97 = vector.shape_cast %89 : vector<8x8xf32> to vector<1x8x8xf32>
    %98 = tpu.concatenate %90, %91, %92, %93, %94, %95, %96, %97 in 0 : vector<1x8x8xf32>, vector<1x8x8xf32>, vector<1x8x8xf32>, vector<1x8x8xf32>, vector<1x8x8xf32>, vector<1x8x8xf32>, vector<1x8x8xf32>, vector<1x8x8xf32> -> vector<8x8x8xf32>
    "tpu.trace_start"() <{level = 10 : i32, message = "nqe,nke->nqk"}> : () -> ()
    %cst_22 = arith.constant dense<0.000000e+00> : vector<8x8x8xf32>
    %99 = tpu.matmul %64, %81, %cst_22 {dimension_numbers = #tpu.dot_dimension_numbers<[2], [2], [1], [1], [0, 0, 0, 1, 1, 1], [0], [0]>} : vector<8x8x8xf32>, vector<8x8x8xf32>, vector<8x8x8xf32> -> vector<8x8x8xf32>
    "tpu.trace_stop"() : () -> ()
    %cst_23 = arith.constant 0.353553385 : f32
    %100 = vector.broadcast %cst_23 : f32 to vector<8x8x8xf32>
    %101 = arith.mulf %99, %100 : vector<8x8x8xf32>
    %102 = vector.broadcast %8 : vector<8x1x8xf32> to vector<8x8x8xf32>
    %103 = arith.addf %101, %102 : vector<8x8x8xf32>
    %cst_24 = arith.constant dense<0xFF800000> : vector<8x8xf32>
    %104 = vector.multi_reduction <maximumf>, %103, %cst_24 [2] : vector<8x8x8xf32> to vector<8x8xf32>
    %105 = vector.shape_cast %104 : vector<8x8xf32> to vector<8x8x1xf32>
    %106 = vector.broadcast %105 : vector<8x8x1xf32> to vector<8x8x8xf32>
    %107 = arith.subf %103, %106 : vector<8x8x8xf32>
    %108 = math.exp %107 : vector<8x8x8xf32>
    %cst_25 = arith.constant dense<0.000000e+00> : vector<8x8xf32>
    %109 = vector.multi_reduction <add>, %108, %cst_25 [2] : vector<8x8x8xf32> to vector<8x8xf32>
    %110 = vector.shape_cast %109 : vector<8x8xf32> to vector<8x8x1xf32>
    %111 = tpu.reciprocal %110 {approx = true} : vector<8x8x1xf32> -> vector<8x8x1xf32>
    %112 = vector.broadcast %111 : vector<8x8x1xf32> to vector<8x8x8xf32>
    %113 = arith.mulf %108, %112 : vector<8x8x8xf32>
    "tpu.trace_start"() <{level = 10 : i32, message = "nqk,nke->nqe"}> : () -> ()
    %cst_26 = arith.constant dense<0.000000e+00> : vector<8x8x8xf32>
    %114 = tpu.matmul %113, %98, %cst_26 {dimension_numbers = #tpu.dot_dimension_numbers<[2], [1], [1], [2], [0, 0, 0, 1, 1, 2], [0], [0]>} : vector<8x8x8xf32>, vector<8x8x8xf32>, vector<8x8x8xf32> -> vector<8x8x8xf32>
    "tpu.trace_stop"() : () -> ()
    %115 = vector.extract_strided_slice %114 {offsets = [0, 0, 0], sizes = [1, 8, 8], strides = [1, 1, 1]} : vector<8x8x8xf32> to vector<1x8x8xf32>
    %116 = vector.shape_cast %115 : vector<1x8x8xf32> to vector<8x8xf32>
    %117 = vector.extract_strided_slice %114 {offsets = [2, 0, 0], sizes = [1, 8, 8], strides = [1, 1, 1]} : vector<8x8x8xf32> to vector<1x8x8xf32>
    %118 = vector.shape_cast %117 : vector<1x8x8xf32> to vector<8x8xf32>
    %119 = vector.extract_strided_slice %114 {offsets = [4, 0, 0], sizes = [1, 8, 8], strides = [1, 1, 1]} : vector<8x8x8xf32> to vector<1x8x8xf32>
    %120 = vector.shape_cast %119 : vector<1x8x8xf32> to vector<8x8xf32>
    %121 = vector.extract_strided_slice %114 {offsets = [6, 0, 0], sizes = [1, 8, 8], strides = [1, 1, 1]} : vector<8x8x8xf32> to vector<1x8x8xf32>
    %122 = vector.shape_cast %121 : vector<1x8x8xf32> to vector<8x8xf32>
    %123 = tpu.concatenate %116, %118, %120, %122 in 1 : vector<8x8xf32>, vector<8x8xf32>, vector<8x8xf32>, vector<8x8xf32> -> vector<8x32xf32>
    %124 = vector.extract_strided_slice %114 {offsets = [1, 0, 0], sizes = [1, 8, 8], strides = [1, 1, 1]} : vector<8x8x8xf32> to vector<1x8x8xf32>
    %125 = vector.shape_cast %124 : vector<1x8x8xf32> to vector<8x8xf32>
    %126 = vector.extract_strided_slice %114 {offsets = [3, 0, 0], sizes = [1, 8, 8], strides = [1, 1, 1]} : vector<8x8x8xf32> to vector<1x8x8xf32>
    %127 = vector.shape_cast %126 : vector<1x8x8xf32> to vector<8x8xf32>
    %128 = vector.extract_strided_slice %114 {offsets = [5, 0, 0], sizes = [1, 8, 8], strides = [1, 1, 1]} : vector<8x8x8xf32> to vector<1x8x8xf32>
    %129 = vector.shape_cast %128 : vector<1x8x8xf32> to vector<8x8xf32>
    %130 = vector.extract_strided_slice %114 {offsets = [7, 0, 0], sizes = [1, 8, 8], strides = [1, 1, 1]} : vector<8x8x8xf32> to vector<1x8x8xf32>
    %131 = vector.shape_cast %130 : vector<1x8x8xf32> to vector<8x8xf32>
    %132 = tpu.concatenate %125, %127, %129, %131 in 1 : vector<8x8xf32>, vector<8x8xf32>, vector<8x8xf32>, vector<8x8xf32> -> vector<8x32xf32>
    %133 = tpu.concatenate %123, %132 in 0 : vector<8x32xf32>, vector<8x32xf32> -> vector<16x32xf32>
    %c0_27 = arith.constant 0 : index
    %c0_28 = arith.constant 0 : index
    %c0_29 = arith.constant 0 : index
    %134 = vector.load %arg4[%c0_27, %c0_28, %c0_29] : memref<2x32x32xf32, #tpu.memory_space<vmem>>, vector<1x32x32xf32>
    %135 = vector.shape_cast %134 : vector<1x32x32xf32> to vector<32x32xf32>
    %cst_30 = arith.constant dense<0.000000e+00> : vector<16x32xf32>
    %136 = tpu.matmul %133, %135, %cst_30 {dimension_numbers = #tpu.dot_dimension_numbers<[1], [0], [0], [1], [0, 0, 1, 1], [], []>} : vector<16x32xf32>, vector<32x32xf32>, vector<16x32xf32> -> vector<16x32xf32>
    %137 = arith.addf %1, %136 : vector<16x32xf32>
    %138 = vector.broadcast %13 : vector<1x32xf32> to vector<16x32xf32>
    %139 = arith.addf %137, %138 : vector<16x32xf32>
    %cst_31 = arith.constant dense<0.000000e+00> : vector<16xf32>
    %140 = vector.multi_reduction <add>, %139, %cst_31 [1] : vector<16x32xf32> to vector<16xf32>
    %141 = vector.shape_cast %140 : vector<16xf32> to vector<16x1xf32>
    %cst_32 = arith.constant 3.200000e+01 : f32
    %142 = vector.broadcast %cst_32 : f32 to vector<16x1xf32>
    %143 = arith.divf %141, %142 : vector<16x1xf32>
    %144 = vector.broadcast %143 : vector<16x1xf32> to vector<16x32xf32>
    %145 = arith.subf %139, %144 : vector<16x32xf32>
    %146 = arith.mulf %145, %145 : vector<16x32xf32>
    %cst_33 = arith.constant dense<0.000000e+00> : vector<16xf32>
    %147 = vector.multi_reduction <add>, %146, %cst_33 [1] : vector<16x32xf32> to vector<16xf32>
    %148 = vector.shape_cast %147 : vector<16xf32> to vector<16x1xf32>
    %cst_34 = arith.constant 3.200000e+01 : f32
    %149 = vector.broadcast %cst_34 : f32 to vector<16x1xf32>
    %150 = arith.divf %148, %149 : vector<16x1xf32>
    %151 = vector.broadcast %143 : vector<16x1xf32> to vector<16x32xf32>
    %152 = arith.subf %139, %151 : vector<16x32xf32>
    %cst_35 = arith.constant 9.99999974E-6 : f32
    %153 = vector.broadcast %cst_35 : f32 to vector<16x1xf32>
    %154 = arith.addf %150, %153 : vector<16x1xf32>
    %155 = math.rsqrt %154 : vector<16x1xf32>
    %156 = vector.broadcast %155 : vector<16x1xf32> to vector<16x32xf32>
    %157 = arith.mulf %152, %156 : vector<16x32xf32>
    %158 = vector.broadcast %14 : vector<1x32xf32> to vector<16x32xf32>
    %159 = arith.mulf %157, %158 : vector<16x32xf32>
    %160 = vector.broadcast %15 : vector<1x32xf32> to vector<16x32xf32>
    %161 = arith.addf %159, %160 : vector<16x32xf32>
    %c0_36 = arith.constant 0 : index
    %c0_37 = arith.constant 0 : index
    %c0_38 = arith.constant 0 : index
    %162 = vector.load %arg5[%c0_36, %c0_37, %c0_38] : memref<2x32x64xf32, #tpu.memory_space<vmem>>, vector<1x32x64xf32>
    %163 = vector.shape_cast %162 : vector<1x32x64xf32> to vector<32x64xf32>
    %cst_39 = arith.constant dense<0.000000e+00> : vector<16x64xf32>
    %164 = tpu.matmul %161, %163, %cst_39 {dimension_numbers = #tpu.dot_dimension_numbers<[1], [0], [0], [1], [0, 0, 1, 1], [], []>} : vector<16x32xf32>, vector<32x64xf32>, vector<16x64xf32> -> vector<16x64xf32>
    %165 = vector.broadcast %20 : vector<1x64xf32> to vector<16x64xf32>
    %166 = arith.addf %164, %165 : vector<16x64xf32>
    %cst_40 = arith.constant 0.000000e+00 : f32
    %167 = vector.broadcast %cst_40 : f32 to vector<16x64xf32>
    %168 = arith.maximumf %166, %167 : vector<16x64xf32>
    %c0_41 = arith.constant 0 : index
    %c0_42 = arith.constant 0 : index
    %c0_43 = arith.constant 0 : index
    %169 = vector.load %arg6[%c0_41, %c0_42, %c0_43] : memref<2x64x32xf32, #tpu.memory_space<vmem>>, vector<1x64x32xf32>
    %170 = vector.shape_cast %169 : vector<1x64x32xf32> to vector<64x32xf32>
    %cst_44 = arith.constant dense<0.000000e+00> : vector<16x32xf32>
    %171 = tpu.matmul %168, %170, %cst_44 {dimension_numbers = #tpu.dot_dimension_numbers<[1], [0], [0], [1], [0, 0, 1, 1], [], []>} : vector<16x64xf32>, vector<64x32xf32>, vector<16x32xf32> -> vector<16x32xf32>
    %172 = arith.addf %139, %171 : vector<16x32xf32>
    %173 = vector.broadcast %16 : vector<1x32xf32> to vector<16x32xf32>
    %174 = arith.addf %172, %173 : vector<16x32xf32>
    %c1 = arith.constant 1 : index
    %c0_45 = arith.constant 0 : index
    %c0_46 = arith.constant 0 : index
    %175 = vector.load %arg8[%c1, %c0_45, %c0_46] : memref<2x6x32xf32, #tpu.memory_space<vmem>>, vector<1x6x32xf32>
    %176 = vector.shape_cast %175 : vector<1x6x32xf32> to vector<6x32xf32>
    %177 = vector.extract_strided_slice %176 {offsets = [0, 0], sizes = [1, 32], strides = [1, 1]} : vector<6x32xf32> to vector<1x32xf32>
    %178 = vector.extract_strided_slice %176 {offsets = [1, 0], sizes = [1, 32], strides = [1, 1]} : vector<6x32xf32> to vector<1x32xf32>
    %179 = vector.extract_strided_slice %176 {offsets = [2, 0], sizes = [1, 32], strides = [1, 1]} : vector<6x32xf32> to vector<1x32xf32>
    %180 = vector.extract_strided_slice %176 {offsets = [3, 0], sizes = [1, 32], strides = [1, 1]} : vector<6x32xf32> to vector<1x32xf32>
    %181 = vector.extract_strided_slice %176 {offsets = [4, 0], sizes = [1, 32], strides = [1, 1]} : vector<6x32xf32> to vector<1x32xf32>
    %182 = vector.extract_strided_slice %176 {offsets = [5, 0], sizes = [1, 32], strides = [1, 1]} : vector<6x32xf32> to vector<1x32xf32>
    %c1_47 = arith.constant 1 : index
    %c0_48 = arith.constant 0 : index
    %c0_49 = arith.constant 0 : index
    %183 = vector.load %arg7[%c1_47, %c0_48, %c0_49] : memref<2x1x160xf32, #tpu.memory_space<vmem>>, vector<1x1x160xf32>
    %184 = vector.shape_cast %183 : vector<1x1x160xf32> to vector<1x160xf32>
    %185 = vector.extract_strided_slice %184 {offsets = [0, 0], sizes = [1, 96], strides = [1, 1]} : vector<1x160xf32> to vector<1x96xf32>
    %186 = vector.extract_strided_slice %184 {offsets = [0, 96], sizes = [1, 64], strides = [1, 1]} : vector<1x160xf32> to vector<1x64xf32>
    %cst_50 = arith.constant dense<0.000000e+00> : vector<16xf32>
    %187 = vector.multi_reduction <add>, %174, %cst_50 [1] : vector<16x32xf32> to vector<16xf32>
    %188 = vector.shape_cast %187 : vector<16xf32> to vector<16x1xf32>
    %cst_51 = arith.constant 3.200000e+01 : f32
    %189 = vector.broadcast %cst_51 : f32 to vector<16x1xf32>
    %190 = arith.divf %188, %189 : vector<16x1xf32>
    %191 = vector.broadcast %190 : vector<16x1xf32> to vector<16x32xf32>
    %192 = arith.subf %174, %191 : vector<16x32xf32>
    %193 = arith.mulf %192, %192 : vector<16x32xf32>
    %cst_52 = arith.constant dense<0.000000e+00> : vector<16xf32>
    %194 = vector.multi_reduction <add>, %193, %cst_52 [1] : vector<16x32xf32> to vector<16xf32>
    %195 = vector.shape_cast %194 : vector<16xf32> to vector<16x1xf32>
    %cst_53 = arith.constant 3.200000e+01 : f32
    %196 = vector.broadcast %cst_53 : f32 to vector<16x1xf32>
    %197 = arith.divf %195, %196 : vector<16x1xf32>
    %198 = vector.broadcast %190 : vector<16x1xf32> to vector<16x32xf32>
    %199 = arith.subf %174, %198 : vector<16x32xf32>
    %cst_54 = arith.constant 9.99999974E-6 : f32
    %200 = vector.broadcast %cst_54 : f32 to vector<16x1xf32>
    %201 = arith.addf %197, %200 : vector<16x1xf32>
    %202 = math.rsqrt %201 : vector<16x1xf32>
    %203 = vector.broadcast %202 : vector<16x1xf32> to vector<16x32xf32>
    %204 = arith.mulf %199, %203 : vector<16x32xf32>
    %205 = vector.broadcast %177 : vector<1x32xf32> to vector<16x32xf32>
    %206 = arith.mulf %204, %205 : vector<16x32xf32>
    %207 = vector.broadcast %178 : vector<1x32xf32> to vector<16x32xf32>
    %208 = arith.addf %206, %207 : vector<16x32xf32>
    %c1_55 = arith.constant 1 : index
    %c0_56 = arith.constant 0 : index
    %c0_57 = arith.constant 0 : index
    %209 = vector.load %arg3[%c1_55, %c0_56, %c0_57] : memref<2x32x96xf32, #tpu.memory_space<vmem>>, vector<1x32x96xf32>
    %210 = vector.shape_cast %209 : vector<1x32x96xf32> to vector<32x96xf32>
    %cst_58 = arith.constant dense<0.000000e+00> : vector<16x96xf32>
    %211 = tpu.matmul %208, %210, %cst_58 {dimension_numbers = #tpu.dot_dimension_numbers<[1], [0], [0], [1], [0, 0, 1, 1], [], []>} : vector<16x32xf32>, vector<32x96xf32>, vector<16x96xf32> -> vector<16x96xf32>
    %212 = vector.broadcast %185 : vector<1x96xf32> to vector<16x96xf32>
    %213 = arith.addf %211, %212 : vector<16x96xf32>
    %214 = vector.extract_strided_slice %213 {offsets = [0, 0], sizes = [8, 8], strides = [1, 1]} : vector<16x96xf32> to vector<8x8xf32>
    %215 = vector.extract_strided_slice %213 {offsets = [8, 0], sizes = [8, 8], strides = [1, 1]} : vector<16x96xf32> to vector<8x8xf32>
    %216 = vector.extract_strided_slice %213 {offsets = [0, 8], sizes = [8, 8], strides = [1, 1]} : vector<16x96xf32> to vector<8x8xf32>
    %217 = vector.extract_strided_slice %213 {offsets = [8, 8], sizes = [8, 8], strides = [1, 1]} : vector<16x96xf32> to vector<8x8xf32>
    %218 = vector.extract_strided_slice %213 {offsets = [0, 16], sizes = [8, 8], strides = [1, 1]} : vector<16x96xf32> to vector<8x8xf32>
    %219 = vector.extract_strided_slice %213 {offsets = [8, 16], sizes = [8, 8], strides = [1, 1]} : vector<16x96xf32> to vector<8x8xf32>
    %220 = vector.extract_strided_slice %213 {offsets = [0, 24], sizes = [8, 8], strides = [1, 1]} : vector<16x96xf32> to vector<8x8xf32>
    %221 = vector.extract_strided_slice %213 {offsets = [8, 24], sizes = [8, 8], strides = [1, 1]} : vector<16x96xf32> to vector<8x8xf32>
    %222 = vector.shape_cast %214 : vector<8x8xf32> to vector<1x8x8xf32>
    %223 = vector.shape_cast %215 : vector<8x8xf32> to vector<1x8x8xf32>
    %224 = vector.shape_cast %216 : vector<8x8xf32> to vector<1x8x8xf32>
    %225 = vector.shape_cast %217 : vector<8x8xf32> to vector<1x8x8xf32>
    %226 = vector.shape_cast %218 : vector<8x8xf32> to vector<1x8x8xf32>
    %227 = vector.shape_cast %219 : vector<8x8xf32> to vector<1x8x8xf32>
    %228 = vector.shape_cast %220 : vector<8x8xf32> to vector<1x8x8xf32>
    %229 = vector.shape_cast %221 : vector<8x8xf32> to vector<1x8x8xf32>
    %230 = tpu.concatenate %222, %223, %224, %225, %226, %227, %228, %229 in 0 : vector<1x8x8xf32>, vector<1x8x8xf32>, vector<1x8x8xf32>, vector<1x8x8xf32>, vector<1x8x8xf32>, vector<1x8x8xf32>, vector<1x8x8xf32>, vector<1x8x8xf32> -> vector<8x8x8xf32>
    %231 = vector.extract_strided_slice %213 {offsets = [0, 32], sizes = [8, 8], strides = [1, 1]} : vector<16x96xf32> to vector<8x8xf32>
    %232 = vector.extract_strided_slice %213 {offsets = [8, 32], sizes = [8, 8], strides = [1, 1]} : vector<16x96xf32> to vector<8x8xf32>
    %233 = vector.extract_strided_slice %213 {offsets = [0, 40], sizes = [8, 8], strides = [1, 1]} : vector<16x96xf32> to vector<8x8xf32>
    %234 = vector.extract_strided_slice %213 {offsets = [8, 40], sizes = [8, 8], strides = [1, 1]} : vector<16x96xf32> to vector<8x8xf32>
    %235 = vector.extract_strided_slice %213 {offsets = [0, 48], sizes = [8, 8], strides = [1, 1]} : vector<16x96xf32> to vector<8x8xf32>
    %236 = vector.extract_strided_slice %213 {offsets = [8, 48], sizes = [8, 8], strides = [1, 1]} : vector<16x96xf32> to vector<8x8xf32>
    %237 = vector.extract_strided_slice %213 {offsets = [0, 56], sizes = [8, 8], strides = [1, 1]} : vector<16x96xf32> to vector<8x8xf32>
    %238 = vector.extract_strided_slice %213 {offsets = [8, 56], sizes = [8, 8], strides = [1, 1]} : vector<16x96xf32> to vector<8x8xf32>
    %239 = vector.shape_cast %231 : vector<8x8xf32> to vector<1x8x8xf32>
    %240 = vector.shape_cast %232 : vector<8x8xf32> to vector<1x8x8xf32>
    %241 = vector.shape_cast %233 : vector<8x8xf32> to vector<1x8x8xf32>
    %242 = vector.shape_cast %234 : vector<8x8xf32> to vector<1x8x8xf32>
    %243 = vector.shape_cast %235 : vector<8x8xf32> to vector<1x8x8xf32>
    %244 = vector.shape_cast %236 : vector<8x8xf32> to vector<1x8x8xf32>
    %245 = vector.shape_cast %237 : vector<8x8xf32> to vector<1x8x8xf32>
    %246 = vector.shape_cast %238 : vector<8x8xf32> to vector<1x8x8xf32>
    %247 = tpu.concatenate %239, %240, %241, %242, %243, %244, %245, %246 in 0 : vector<1x8x8xf32>, vector<1x8x8xf32>, vector<1x8x8xf32>, vector<1x8x8xf32>, vector<1x8x8xf32>, vector<1x8x8xf32>, vector<1x8x8xf32>, vector<1x8x8xf32> -> vector<8x8x8xf32>
    %248 = vector.extract_strided_slice %213 {offsets = [0, 64], sizes = [8, 8], strides = [1, 1]} : vector<16x96xf32> to vector<8x8xf32>
    %249 = vector.extract_strided_slice %213 {offsets = [8, 64], sizes = [8, 8], strides = [1, 1]} : vector<16x96xf32> to vector<8x8xf32>
    %250 = vector.extract_strided_slice %213 {offsets = [0, 72], sizes = [8, 8], strides = [1, 1]} : vector<16x96xf32> to vector<8x8xf32>
    %251 = vector.extract_strided_slice %213 {offsets = [8, 72], sizes = [8, 8], strides = [1, 1]} : vector<16x96xf32> to vector<8x8xf32>
    %252 = vector.extract_strided_slice %213 {offsets = [0, 80], sizes = [8, 8], strides = [1, 1]} : vector<16x96xf32> to vector<8x8xf32>
    %253 = vector.extract_strided_slice %213 {offsets = [8, 80], sizes = [8, 8], strides = [1, 1]} : vector<16x96xf32> to vector<8x8xf32>
    %254 = vector.extract_strided_slice %213 {offsets = [0, 88], sizes = [8, 8], strides = [1, 1]} : vector<16x96xf32> to vector<8x8xf32>
    %255 = vector.extract_strided_slice %213 {offsets = [8, 88], sizes = [8, 8], strides = [1, 1]} : vector<16x96xf32> to vector<8x8xf32>
    %256 = vector.shape_cast %248 : vector<8x8xf32> to vector<1x8x8xf32>
    %257 = vector.shape_cast %249 : vector<8x8xf32> to vector<1x8x8xf32>
    %258 = vector.shape_cast %250 : vector<8x8xf32> to vector<1x8x8xf32>
    %259 = vector.shape_cast %251 : vector<8x8xf32> to vector<1x8x8xf32>
    %260 = vector.shape_cast %252 : vector<8x8xf32> to vector<1x8x8xf32>
    %261 = vector.shape_cast %253 : vector<8x8xf32> to vector<1x8x8xf32>
    %262 = vector.shape_cast %254 : vector<8x8xf32> to vector<1x8x8xf32>
    %263 = vector.shape_cast %255 : vector<8x8xf32> to vector<1x8x8xf32>
    %264 = tpu.concatenate %256, %257, %258, %259, %260, %261, %262, %263 in 0 : vector<1x8x8xf32>, vector<1x8x8xf32>, vector<1x8x8xf32>, vector<1x8x8xf32>, vector<1x8x8xf32>, vector<1x8x8xf32>, vector<1x8x8xf32>, vector<1x8x8xf32> -> vector<8x8x8xf32>
    "tpu.trace_start"() <{level = 10 : i32, message = "nqe,nke->nqk"}> : () -> ()
    %cst_59 = arith.constant dense<0.000000e+00> : vector<8x8x8xf32>
    %265 = tpu.matmul %230, %247, %cst_59 {dimension_numbers = #tpu.dot_dimension_numbers<[2], [2], [1], [1], [0, 0, 0, 1, 1, 1], [0], [0]>} : vector<8x8x8xf32>, vector<8x8x8xf32>, vector<8x8x8xf32> -> vector<8x8x8xf32>
    "tpu.trace_stop"() : () -> ()
    %cst_60 = arith.constant 0.353553385 : f32
    %266 = vector.broadcast %cst_60 : f32 to vector<8x8x8xf32>
    %267 = arith.mulf %265, %266 : vector<8x8x8xf32>
    %268 = vector.broadcast %8 : vector<8x1x8xf32> to vector<8x8x8xf32>
    %269 = arith.addf %267, %268 : vector<8x8x8xf32>
    %cst_61 = arith.constant dense<0xFF800000> : vector<8x8xf32>
    %270 = vector.multi_reduction <maximumf>, %269, %cst_61 [2] : vector<8x8x8xf32> to vector<8x8xf32>
    %271 = vector.shape_cast %270 : vector<8x8xf32> to vector<8x8x1xf32>
    %272 = vector.broadcast %271 : vector<8x8x1xf32> to vector<8x8x8xf32>
    %273 = arith.subf %269, %272 : vector<8x8x8xf32>
    %274 = math.exp %273 : vector<8x8x8xf32>
    %cst_62 = arith.constant dense<0.000000e+00> : vector<8x8xf32>
    %275 = vector.multi_reduction <add>, %274, %cst_62 [2] : vector<8x8x8xf32> to vector<8x8xf32>
    %276 = vector.shape_cast %275 : vector<8x8xf32> to vector<8x8x1xf32>
    %277 = tpu.reciprocal %276 {approx = true} : vector<8x8x1xf32> -> vector<8x8x1xf32>
    %278 = vector.broadcast %277 : vector<8x8x1xf32> to vector<8x8x8xf32>
    %279 = arith.mulf %274, %278 : vector<8x8x8xf32>
    "tpu.trace_start"() <{level = 10 : i32, message = "nqk,nke->nqe"}> : () -> ()
    %cst_63 = arith.constant dense<0.000000e+00> : vector<8x8x8xf32>
    %280 = tpu.matmul %279, %264, %cst_63 {dimension_numbers = #tpu.dot_dimension_numbers<[2], [1], [1], [2], [0, 0, 0, 1, 1, 2], [0], [0]>} : vector<8x8x8xf32>, vector<8x8x8xf32>, vector<8x8x8xf32> -> vector<8x8x8xf32>
    "tpu.trace_stop"() : () -> ()
    %281 = vector.extract_strided_slice %280 {offsets = [0, 0, 0], sizes = [1, 8, 8], strides = [1, 1, 1]} : vector<8x8x8xf32> to vector<1x8x8xf32>
    %282 = vector.shape_cast %281 : vector<1x8x8xf32> to vector<8x8xf32>
    %283 = vector.extract_strided_slice %280 {offsets = [2, 0, 0], sizes = [1, 8, 8], strides = [1, 1, 1]} : vector<8x8x8xf32> to vector<1x8x8xf32>
    %284 = vector.shape_cast %283 : vector<1x8x8xf32> to vector<8x8xf32>
    %285 = vector.extract_strided_slice %280 {offsets = [4, 0, 0], sizes = [1, 8, 8], strides = [1, 1, 1]} : vector<8x8x8xf32> to vector<1x8x8xf32>
    %286 = vector.shape_cast %285 : vector<1x8x8xf32> to vector<8x8xf32>
    %287 = vector.extract_strided_slice %280 {offsets = [6, 0, 0], sizes = [1, 8, 8], strides = [1, 1, 1]} : vector<8x8x8xf32> to vector<1x8x8xf32>
    %288 = vector.shape_cast %287 : vector<1x8x8xf32> to vector<8x8xf32>
    %289 = tpu.concatenate %282, %284, %286, %288 in 1 : vector<8x8xf32>, vector<8x8xf32>, vector<8x8xf32>, vector<8x8xf32> -> vector<8x32xf32>
    %290 = vector.extract_strided_slice %280 {offsets = [1, 0, 0], sizes = [1, 8, 8], strides = [1, 1, 1]} : vector<8x8x8xf32> to vector<1x8x8xf32>
    %291 = vector.shape_cast %290 : vector<1x8x8xf32> to vector<8x8xf32>
    %292 = vector.extract_strided_slice %280 {offsets = [3, 0, 0], sizes = [1, 8, 8], strides = [1, 1, 1]} : vector<8x8x8xf32> to vector<1x8x8xf32>
    %293 = vector.shape_cast %292 : vector<1x8x8xf32> to vector<8x8xf32>
    %294 = vector.extract_strided_slice %280 {offsets = [5, 0, 0], sizes = [1, 8, 8], strides = [1, 1, 1]} : vector<8x8x8xf32> to vector<1x8x8xf32>
    %295 = vector.shape_cast %294 : vector<1x8x8xf32> to vector<8x8xf32>
    %296 = vector.extract_strided_slice %280 {offsets = [7, 0, 0], sizes = [1, 8, 8], strides = [1, 1, 1]} : vector<8x8x8xf32> to vector<1x8x8xf32>
    %297 = vector.shape_cast %296 : vector<1x8x8xf32> to vector<8x8xf32>
    %298 = tpu.concatenate %291, %293, %295, %297 in 1 : vector<8x8xf32>, vector<8x8xf32>, vector<8x8xf32>, vector<8x8xf32> -> vector<8x32xf32>
    %299 = tpu.concatenate %289, %298 in 0 : vector<8x32xf32>, vector<8x32xf32> -> vector<16x32xf32>
    %c1_64 = arith.constant 1 : index
    %c0_65 = arith.constant 0 : index
    %c0_66 = arith.constant 0 : index
    %300 = vector.load %arg4[%c1_64, %c0_65, %c0_66] : memref<2x32x32xf32, #tpu.memory_space<vmem>>, vector<1x32x32xf32>
    %301 = vector.shape_cast %300 : vector<1x32x32xf32> to vector<32x32xf32>
    %cst_67 = arith.constant dense<0.000000e+00> : vector<16x32xf32>
    %302 = tpu.matmul %299, %301, %cst_67 {dimension_numbers = #tpu.dot_dimension_numbers<[1], [0], [0], [1], [0, 0, 1, 1], [], []>} : vector<16x32xf32>, vector<32x32xf32>, vector<16x32xf32> -> vector<16x32xf32>
    %303 = arith.addf %174, %302 : vector<16x32xf32>
    %304 = vector.broadcast %179 : vector<1x32xf32> to vector<16x32xf32>
    %305 = arith.addf %303, %304 : vector<16x32xf32>
    %cst_68 = arith.constant dense<0.000000e+00> : vector<16xf32>
    %306 = vector.multi_reduction <add>, %305, %cst_68 [1] : vector<16x32xf32> to vector<16xf32>
    %307 = vector.shape_cast %306 : vector<16xf32> to vector<16x1xf32>
    %cst_69 = arith.constant 3.200000e+01 : f32
    %308 = vector.broadcast %cst_69 : f32 to vector<16x1xf32>
    %309 = arith.divf %307, %308 : vector<16x1xf32>
    %310 = vector.broadcast %309 : vector<16x1xf32> to vector<16x32xf32>
    %311 = arith.subf %305, %310 : vector<16x32xf32>
    %312 = arith.mulf %311, %311 : vector<16x32xf32>
    %cst_70 = arith.constant dense<0.000000e+00> : vector<16xf32>
    %313 = vector.multi_reduction <add>, %312, %cst_70 [1] : vector<16x32xf32> to vector<16xf32>
    %314 = vector.shape_cast %313 : vector<16xf32> to vector<16x1xf32>
    %cst_71 = arith.constant 3.200000e+01 : f32
    %315 = vector.broadcast %cst_71 : f32 to vector<16x1xf32>
    %316 = arith.divf %314, %315 : vector<16x1xf32>
    %317 = vector.broadcast %309 : vector<16x1xf32> to vector<16x32xf32>
    %318 = arith.subf %305, %317 : vector<16x32xf32>
    %cst_72 = arith.constant 9.99999974E-6 : f32
    %319 = vector.broadcast %cst_72 : f32 to vector<16x1xf32>
    %320 = arith.addf %316, %319 : vector<16x1xf32>
    %321 = math.rsqrt %320 : vector<16x1xf32>
    %322 = vector.broadcast %321 : vector<16x1xf32> to vector<16x32xf32>
    %323 = arith.mulf %318, %322 : vector<16x32xf32>
    %324 = vector.broadcast %180 : vector<1x32xf32> to vector<16x32xf32>
    %325 = arith.mulf %323, %324 : vector<16x32xf32>
    %326 = vector.broadcast %181 : vector<1x32xf32> to vector<16x32xf32>
    %327 = arith.addf %325, %326 : vector<16x32xf32>
    %c1_73 = arith.constant 1 : index
    %c0_74 = arith.constant 0 : index
    %c0_75 = arith.constant 0 : index
    %328 = vector.load %arg5[%c1_73, %c0_74, %c0_75] : memref<2x32x64xf32, #tpu.memory_space<vmem>>, vector<1x32x64xf32>
    %329 = vector.shape_cast %328 : vector<1x32x64xf32> to vector<32x64xf32>
    %cst_76 = arith.constant dense<0.000000e+00> : vector<16x64xf32>
    %330 = tpu.matmul %327, %329, %cst_76 {dimension_numbers = #tpu.dot_dimension_numbers<[1], [0], [0], [1], [0, 0, 1, 1], [], []>} : vector<16x32xf32>, vector<32x64xf32>, vector<16x64xf32> -> vector<16x64xf32>
    %331 = vector.broadcast %186 : vector<1x64xf32> to vector<16x64xf32>
    %332 = arith.addf %330, %331 : vector<16x64xf32>
    %cst_77 = arith.constant 0.000000e+00 : f32
    %333 = vector.broadcast %cst_77 : f32 to vector<16x64xf32>
    %334 = arith.maximumf %332, %333 : vector<16x64xf32>
    %c1_78 = arith.constant 1 : index
    %c0_79 = arith.constant 0 : index
    %c0_80 = arith.constant 0 : index
    %335 = vector.load %arg6[%c1_78, %c0_79, %c0_80] : memref<2x64x32xf32, #tpu.memory_space<vmem>>, vector<1x64x32xf32>
    %336 = vector.shape_cast %335 : vector<1x64x32xf32> to vector<64x32xf32>
    %cst_81 = arith.constant dense<0.000000e+00> : vector<16x32xf32>
    %337 = tpu.matmul %334, %336, %cst_81 {dimension_numbers = #tpu.dot_dimension_numbers<[1], [0], [0], [1], [0, 0, 1, 1], [], []>} : vector<16x64xf32>, vector<64x32xf32>, vector<16x32xf32> -> vector<16x32xf32>
    %338 = arith.addf %305, %337 : vector<16x32xf32>
    %339 = vector.broadcast %182 : vector<1x32xf32> to vector<16x32xf32>
    %340 = arith.addf %338, %339 : vector<16x32xf32>
    %c0_82 = arith.constant 0 : index
    %c0_83 = arith.constant 0 : index
    %341 = vector.load %arg9[%c0_82, %c0_83] : memref<2x32xf32, #tpu.memory_space<vmem>>, vector<2x32xf32>
    %342 = vector.extract_strided_slice %341 {offsets = [0, 0], sizes = [1, 32], strides = [1, 1]} : vector<2x32xf32> to vector<1x32xf32>
    %343 = vector.extract_strided_slice %341 {offsets = [1, 0], sizes = [1, 32], strides = [1, 1]} : vector<2x32xf32> to vector<1x32xf32>
    %cst_84 = arith.constant dense<0.000000e+00> : vector<16xf32>
    %344 = vector.multi_reduction <add>, %340, %cst_84 [1] : vector<16x32xf32> to vector<16xf32>
    %345 = vector.shape_cast %344 : vector<16xf32> to vector<16x1xf32>
    %cst_85 = arith.constant 3.200000e+01 : f32
    %346 = vector.broadcast %cst_85 : f32 to vector<16x1xf32>
    %347 = arith.divf %345, %346 : vector<16x1xf32>
    %348 = vector.broadcast %347 : vector<16x1xf32> to vector<16x32xf32>
    %349 = arith.subf %340, %348 : vector<16x32xf32>
    %350 = arith.mulf %349, %349 : vector<16x32xf32>
    %cst_86 = arith.constant dense<0.000000e+00> : vector<16xf32>
    %351 = vector.multi_reduction <add>, %350, %cst_86 [1] : vector<16x32xf32> to vector<16xf32>
    %352 = vector.shape_cast %351 : vector<16xf32> to vector<16x1xf32>
    %cst_87 = arith.constant 3.200000e+01 : f32
    %353 = vector.broadcast %cst_87 : f32 to vector<16x1xf32>
    %354 = arith.divf %352, %353 : vector<16x1xf32>
    %355 = vector.broadcast %347 : vector<16x1xf32> to vector<16x32xf32>
    %356 = arith.subf %340, %355 : vector<16x32xf32>
    %cst_88 = arith.constant 9.99999974E-6 : f32
    %357 = vector.broadcast %cst_88 : f32 to vector<16x1xf32>
    %358 = arith.addf %354, %357 : vector<16x1xf32>
    %359 = math.rsqrt %358 : vector<16x1xf32>
    %360 = vector.broadcast %359 : vector<16x1xf32> to vector<16x32xf32>
    %361 = arith.mulf %356, %360 : vector<16x32xf32>
    %362 = vector.broadcast %342 : vector<1x32xf32> to vector<16x32xf32>
    %363 = arith.mulf %361, %362 : vector<16x32xf32>
    %364 = vector.broadcast %343 : vector<1x32xf32> to vector<16x32xf32>
    %365 = arith.addf %363, %364 : vector<16x32xf32>
    %366 = vector.shape_cast %365 : vector<16x32xf32> to vector<2x8x32xf32>
    %c0_89 = arith.constant 0 : index
    %c0_90 = arith.constant 0 : index
    %c0_91 = arith.constant 0 : index
    %367 = vector.load %arg10[%c0_89, %c0_90, %c0_91] : memref<2x8x32xf32, #tpu.memory_space<vmem>>, vector<2x8x32xf32>
    tpu.vector_store %arg10[%c0_89, %c0_90, %c0_91], %366 {strides = array<i32>} : memref<2x8x32xf32, #tpu.memory_space<vmem>>, vector<2x8x32xf32>,
    return
  }
  func.func @transform_0(%arg0: i32) -> (i32, i32, i32) {
    %c0_i32 = arith.constant 0 : i32
    %c0_i32_0 = arith.constant 0 : i32
    %c0_i32_1 = arith.constant 0 : i32
    %c0_i32_2 = arith.constant 0 : i32
    return %c0_i32, %c0_i32_0, %c0_i32_1 : i32, i32, i32
  }
  func.func @transform_1(%arg0: i32) -> (i32, i32, i32) {
    %c0_i32 = arith.constant 0 : i32
    %c0_i32_0 = arith.constant 0 : i32
    %c0_i32_1 = arith.constant 0 : i32
    %c0_i32_2 = arith.constant 0 : i32
    return %c0_i32, %c0_i32_0, %c0_i32_1 : i32, i32, i32
  }
  func.func @transform_2(%arg0: i32) -> (i32, i32, i32) {
    %c0_i32 = arith.constant 0 : i32
    %c0_i32_0 = arith.constant 0 : i32
    %c0_i32_1 = arith.constant 0 : i32
    %c0_i32_2 = arith.constant 0 : i32
    return %c0_i32, %c0_i32_0, %c0_i32_1 : i32, i32, i32
  }
  func.func @transform_3(%arg0: i32) -> (i32, i32, i32) {
    %c0_i32 = arith.constant 0 : i32
    %c0_i32_0 = arith.constant 0 : i32
    %c0_i32_1 = arith.constant 0 : i32
    %c0_i32_2 = arith.constant 0 : i32
    return %c0_i32, %c0_i32_0, %c0_i32_1 : i32, i32, i32
  }
  func.func @transform_4(%arg0: i32) -> (i32, i32, i32) {
    %c0_i32 = arith.constant 0 : i32
    %c0_i32_0 = arith.constant 0 : i32
    %c0_i32_1 = arith.constant 0 : i32
    %c0_i32_2 = arith.constant 0 : i32
    return %c0_i32, %c0_i32_0, %c0_i32_1 : i32, i32, i32
  }
  func.func @transform_5(%arg0: i32) -> (i32, i32, i32) {
    %c0_i32 = arith.constant 0 : i32
    %c0_i32_0 = arith.constant 0 : i32
    %c0_i32_1 = arith.constant 0 : i32
    %c0_i32_2 = arith.constant 0 : i32
    return %c0_i32, %c0_i32_0, %c0_i32_1 : i32, i32, i32
  }
  func.func @transform_6(%arg0: i32) -> (i32, i32, i32) {
    %c0_i32 = arith.constant 0 : i32
    %c0_i32_0 = arith.constant 0 : i32
    %c0_i32_1 = arith.constant 0 : i32
    %c0_i32_2 = arith.constant 0 : i32
    return %c0_i32, %c0_i32_0, %c0_i32_1 : i32, i32, i32
  }
  func.func @transform_7(%arg0: i32) -> (i32, i32, i32) {
    %c0_i32 = arith.constant 0 : i32
    %c0_i32_0 = arith.constant 0 : i32
    %c0_i32_1 = arith.constant 0 : i32
    %c0_i32_2 = arith.constant 0 : i32
    return %c0_i32, %c0_i32_0, %c0_i32_1 : i32, i32, i32
  }
  func.func @transform_8(%arg0: i32) -> (i32, i32) {
    %c0_i32 = arith.constant 0 : i32
    %c0_i32_0 = arith.constant 0 : i32
    %c0_i32_1 = arith.constant 0 : i32
    return %c0_i32, %c0_i32_0 : i32, i32
  }
  func.func @transform_9(%arg0: i32) -> (i32, i32, i32) {
    %c0_i32 = arith.constant 0 : i32
    %c0_i32_0 = arith.constant 0 : i32
    %c0_i32_1 = arith.constant 0 : i32
    %c0_i32_2 = arith.constant 0 : i32
    return %c0_i32, %c0_i32_0, %c0_i32_1 : i32, i32, i32
  }
}

</mosaic_0001>

<bundles_post_ra>
// kernel: encoder_forward.1
= control target key start
LH: loop header
LB: loop body
LE: loop exit
PB: predicated region body
PF: predicated region fallthrough
CT: control target
= control target key end

     0   :  { %vm43_vm0 = vcmask 261120   ;;  %s5204_s0 = inlined_call_operand.vmem [shape: f32[2,8,32], index: 0, kind: input, shape index: {}]   ;;  %s5205_s1 = inlined_call_operand.vmem [shape: f32[2,1,8], index: 1, kind: input, shape index: {}]   ;;  %s5206_s2 = inlined_call_operand.vmem [shape: f32[2,32,96], index: 2, kind: input, shape index: {}]   ;;  %s5207_s3 = inlined_call_operand.vmem [shape: f32[2,32,32], index: 3, kind: input, shape index: {}]   ;;  %s5208_s4 = inlined_call_operand.vmem [shape: f32[2,32,64], index: 4, kind: input, shape index: {}]   ;;  %s5209_s5 = inlined_call_operand.vmem [shape: f32[2,64,32], index: 5, kind: input, shape index: {}]   ;;  %s5210_s6 = inlined_call_operand.vmem [shape: f32[2,1,160], index: 6, kind: input, shape index: {}]   ;;  %s5211_s7 = inlined_call_operand.vmem [shape: f32[2,6,32], index: 7, kind: input, shape index: {}]   ;;  %s5212_s8 = inlined_call_operand.vmem [shape: f32[2,32], index: 8, kind: input, shape index: {}]   ;;  %s5213_s9 = inlined_call_operand.hbm [shape: f32[2,8,32], index: 9, kind: output, shape index: {}]  }
   0x1   :  { %v4499_v0 = vld [vmem:[%s5204_s0] sm:$0xff]  ;;  %v4504_v1 = vld [vmem:[%s5204_s0 + $0x8] sm:$0xff] }
   0x2   :  { %14 = vsyncpa [#allocation3], 0  ;;  %v44_v2 = vsel %vm43_vm0, %v4499_v0, 0.0  ;;  %v47_v3 = vsel %vm43_vm0, %v4504_v1, 0.0  ;;  %v83_v14 = vld [vmem:[%s5206_s2] sm:$0xff]  ;;  %v84_v15 = vld [vmem:[%s5206_s2 + $0x8] sm:$0xff]  ;;  %v71_v22 = vlaneseq }
   0x3   :  { %45 = vadd.xlane.f32.xlu0 %v44_v2  ;;  %v85_v16 = vld [vmem:[%s5206_s2 + $0x10] sm:$0xff]  ;;  %v4232_v17 = vpack.c.bf16 %v84_v15, %v83_v14  ;;  %v86_v18 = vld [vmem:[%s5206_s2 + $0x18] sm:$0xff]  ;;  %v4534_v29 = vld [vmem:[%s5211_s7] sm:$0x3f]  ;;  %v4433_v43 = vmov 0.0   ;;  %vm4434_vm1 = vmmov 0  }
   0x4   :  { %v4236_v19 = vpack.c.bf16 %v86_v18, %v85_v16  ;;  %v4526_v26 = vshrl.u32 %v71_v22, 7  ;;  %v4548_v41 = vld [vmem:[%s5210_s6] sm:$0x3]  ;;  %3989 = vmatprep.subr.mxu0 %v4433_v43  ;;  %3991 = vmatprep.mubr.msk.f32.mxu0 %vm4434_vm1, %v4433_v43  ;;  %s4435_s24 = smov 120   ;;  %s4436_s25 = smov 112   ;;  %vm190_vm2 = vcmask 64512  }
   0x5   :  { %4233 = vmatprep.subr.bf16.mxu1 %v4232_v17  ;;  %s4437_s26 = smov 104   ;;  %s4438_s27 = smov 96   ;;  %v35_v62 = vld [vmem:[%s5205_s1] sm:$0x1]  ;;  %v36_v2 = vld [vmem:[%s5205_s1 + $0x1] sm:$0x1] }
   0x6   :  { %4235 = vmatpush3.bf16.msra.mxu1 %v4232_v17  ;;  %v4529_v28 = vsub.s32 0, %v4526_v26  ;;  %v4537_v30 = vsub.s32 1, %v4526_v26  ;;  %vm37_vm3 = vcmp.eq.f32.partialorder %v35_v62, 0.0  ;;  %vm38_vm4 = vcmp.eq.f32.partialorder %v36_v2, 0.0  ;;  %s4439_s1 = smov 64   ;;  %s4440_s18 = smov 8  }
   0x7   :  { %48 = vadd.xlane.f32.xlu0 %v47_v3  ;;  %4237 = vmatprep.subr.bf16.mxu1 %v4236_v19  ;;  %v39_v63 = vsel %vm37_vm3, -1e+09, %v4433_v43  ;;  %s4441_s19 = smov 16   ;;  %s4442_s20 = smov 24   ;;  %vm1534_vm5 = vcmask 130048   ;;  %vm1536_vm6 = vcmask 195584  }
   0x8   :  { %v74_v31 = vrot.slane %v4534_v29, %v4529_v28  ;;  %v80_v34 = vrot.slane %v4534_v29, %v4537_v30  ;;  %v4552_v42 = vrot.slane %v4548_v41, %v4529_v28  ;;  %v4662_v3 = vrot.slane %v39_v63, %v4529_v28  ;;  %s4443_s17 = smov 32   ;;  %s4444_s10 = smov [#allocation2]  }
   0x9   :  { %vm1789_vm7 = vcmask 523264   ;;  %s3751_s11 = sshll.u32 %s4444_s10, 4  ;;  %s3752_s11 = int_to_ptr.vmem [resolvable:$true] %s3751_s11 }
   0xa   :  { %4239 = vmatpush3.bf16.msra.mxu1 %v4236_v19  ;;  %p4414_p1 = scmp.lt.s32.totalorder %s3752_s11, %s3752_s11 }
   0xb   :  { %3979 = vmatprep.subr.mxu1 %v4433_v43 }
  0x90   :  { %v46_v4 = vpop.xlane.xlu0 %45 }
  0x91   :  { %v51_v5 = vmul.f32 0.03125, %v46_v4 }
  0x93   :  { %v53_v6 = vsub.f32 %v4499_v0, %v51_v5 }
  0x94   :  { %v49_v7 = vpop.xlane.xlu0 %48 }
  0x95   :  { %v52_v8 = vmul.f32 0.03125, %v49_v7  ;;  %v55_v9 = vmul.f32 %v53_v6, %v53_v6 }
  0x97   :  { %v54_v10 = vsub.f32 %v4504_v1, %v52_v8  ;;  %v57_v11 = vsel %vm43_vm0, %v55_v9, 0.0  ;;  %v40_v8 = vsel %vm38_vm4, -1e+09, %v4433_v43 }
  0x98   :  { %58 = vadd.xlane.f32.xlu1 %v57_v11 }
  0x99   :  { %v56_v12 = vmul.f32 %v54_v10, %v54_v10 }
  0x9b   :  { %v60_v13 = vsel %vm43_vm0, %v56_v12, 0.0 }
  0x9c   :  { %61 = vadd.xlane.f32.xlu1 %v60_v13 }
 0x125   :  { %v59_v20 = vpop.xlane.xlu1 %58 }
 0x126   :  { %v63_v21 = vmul.f32 0.03125, %v59_v20 }
 0x128   :  { %v65_v23 = vadd.f32 1e-05, %v63_v21 }
 0x129   :  { %v62_v24 = vpop.xlane.xlu1 %61 }
 0x12a   :  { %4325 = vrsqrt.f32 %v65_v23  ;;  %v64_v25 = vmul.f32 0.03125, %v62_v24 }
 0x12c   :  { %v66_v27 = vadd.f32 1e-05, %v64_v25 }
 0x12e   :  { %4327 = vrsqrt.f32 %v66_v27 }
 0x134   :  { %v4326_v32 = vpop.eup %4325 }
 0x135   :  { %v69_v33 = vmul.f32 %v4326_v32, %v53_v6 }
 0x137   :  { %v75_v35 = vmul.f32 %v74_v31, %v69_v33 }
 0x138   :  { %v4328_v36 = vpop.eup %4327 }
 0x139   :  { %v70_v37 = vmul.f32 %v4328_v36, %v54_v10  ;;  %v81_v38 = vadd.f32 %v80_v34, %v75_v35  ;;  %v4668_v10 = vrot.slane %v40_v8, %v4529_v28 }
 0x13b   :  { %v76_v39 = vmul.f32 %v74_v31, %v70_v37  ;;  %3976 = vmatprep.mubr.msk.f32.mxu1 %vm43_vm0, %v81_v38 }
 0x13d   :  { %v82_v40 = vadd.f32 %v80_v34, %v76_v39 }
 0x13f   :  { %3977 = vmatmul.mubr.msk.f32.vlgmr.msra.gmra.mrb[0].mxu1 %vm43_vm0, %v82_v40 }
 0x140   :  { %3981 = vmatprep.mubr.msk.f32.mxu1 %vm4434_vm1, %v4433_v43 }
 0x212   :  { %v3978_v44 = vpop.f32.mrb[0].mxu1 }
 0x213   :  { %v4561_v45 = vadd.f32 %v3978_v44, %v4552_v42  ;;  %v165_v46 = vpop.f32.mrb[1].mxu1 }
 0x214   :  { %v4564_v47 = vadd.f32 %v165_v46, %v4552_v42 }
 0x215   :  { %178 = vrot.lane.b32.xlu1 %v4561_v45, %s4435_s24 }
 0x216   :  { %175 = vrot.lane.b32.xlu0 %v4564_v47, %s4435_s24 }
 0x219   :  { %180 = vrot.lane.b32.xlu1 %v4564_v47, %s4436_s25 }
 0x21a   :  { %184 = vrot.lane.b32.xlu0 %v4564_v47, %s4437_s26 }
 0x21d   :  { %182 = vrot.lane.b32.xlu1 %v4561_v45, %s4436_s25 }
 0x21e   :  { %188 = vrot.lane.b32.xlu0 %v4564_v47, %s4438_s27 }
 0x221   :  { %186 = vrot.lane.b32.xlu1 %v4561_v45, %s4437_s26 }
 0x225   :  { %265 = vrot.lane.b32.xlu1 %v4561_v45, %s4438_s27 }
 0x287   :  { %v4582_v48 = vpop.permute.xlu1 %178 }
 0x288   :  { %417 = vrot.lane.b32.xlu1 %v4582_v48, %s4438_s27  ;;  %v4586_v49 = vpop.permute.xlu0 %175 }
 0x289   :  { %341 = vrot.lane.b32.xlu0 %v4586_v49, %s4438_s27 }
 0x28b   :  { %v4590_v50 = vpop.permute.xlu1 %180 }
 0x28c   :  { %v4592_v51 = vpop.permute.xlu0 %184 }
 0x28d   :  { %493 = vrot.lane.b32.xlu0 %v4590_v50, %s4438_s27 }
 0x28f   :  { %v4596_v52 = vpop.permute.xlu1 %182 }
 0x290   :  { %569 = vrot.lane.b32.xlu1 %v4596_v52, %s4438_s27  ;;  %v189_v53 = vpop.permute.xlu0 %188 }
 0x291   :  { %645 = vrot.lane.b32.xlu0 %v4592_v51, %s4438_s27  ;;  %3980 = vmatpush3.xpose.msk.msra.mxu1 %vm190_vm2, %v189_v53 }
 0x292   :  { %3984 = vmatprep.subr.mxu1 %v4433_v43 }
 0x293   :  { %v4604_v54 = vpop.permute.xlu1 %186 }
 0x294   :  { %721 = vrot.lane.b32.xlu1 %v4604_v54, %s4438_s27  ;;  %3982 = vmatmul.mubr.msk.f32.vlgmr.msra.gmra.mrb[2].mxu1 %vm190_vm2, %v4564_v47 }
 0x295   :  { %3986 = vmatprep.mubr.msk.f32.mxu1 %vm4434_vm1, %v4433_v43 }
 0x297   :  { %v266_v55 = vpop.permute.xlu1 %265 }
 0x298   :  { %3985 = vmatpush3.xpose.msk.msra.mxu1 %vm190_vm2, %v266_v55 }
 0x299   :  { %3994 = vmatprep.subr.mxu1 %v4433_v43 }
 0x29b   :  { %3987 = vmatmul.mubr.msk.f32.vlgmr.msra.gmra.mrb[4].mxu1 %vm190_vm2, %v4561_v45 }
 0x29c   :  { %3996 = vmatprep.mubr.msk.f32.mxu1 %vm4434_vm1, %v4433_v43 }
 0x2fa   :  { %v418_v56 = vpop.permute.xlu1 %417 }
 0x2fb   :  { %3995 = vmatpush3.xpose.msk.msra.mxu1 %vm190_vm2, %v418_v56  ;;  %v342_v57 = vpop.permute.xlu0 %341 }
 0x2fc   :  { %3990 = vmatpush3.xpose.msk.msra.mxu0 %vm190_vm2, %v342_v57  ;;  %4004 = vmatprep.subr.mxu1 %v4433_v43 }
 0x2fd   :  { %3999 = vmatprep.subr.mxu0 %v4433_v43 }
 0x2fe   :  { %3997 = vmatmul.mubr.msk.f32.vlgmr.msra.gmra.mrb[6].mxu1 %vm190_vm2, %v4582_v48 }
 0x2ff   :  { %3992 = vmatmul.mubr.msk.f32.vlgmr.msra.gmra.mrb[0].mxu0 %vm190_vm2, %v4586_v49  ;;  %v494_v58 = vpop.permute.xlu0 %493  ;;  %4006 = vmatprep.mubr.msk.f32.mxu1 %vm4434_vm1, %v4433_v43 }
 0x300   :  { %4000 = vmatpush3.xpose.msk.msra.mxu0 %vm190_vm2, %v494_v58  ;;  %4001 = vmatprep.mubr.msk.f32.mxu0 %vm4434_vm1, %v4433_v43 }
 0x301   :  { %4009 = vmatprep.subr.mxu0 %v4433_v43 }
 0x302   :  { %v570_v59 = vpop.permute.xlu1 %569 }
 0x303   :  { %4002 = vmatmul.mubr.msk.f32.vlgmr.msra.gmra.mrb[2].mxu0 %vm190_vm2, %v4590_v50  ;;  %4005 = vmatpush3.xpose.msk.msra.mxu1 %vm190_vm2, %v570_v59  ;;  %v646_v60 = vpop.permute.xlu0 %645 }
 0x304   :  { %4010 = vmatpush3.xpose.msk.msra.mxu0 %vm190_vm2, %v646_v60  ;;  %4011 = vmatprep.mubr.msk.f32.mxu0 %vm4434_vm1, %v4433_v43 }
 0x305   :  { %4014 = vmatprep.subr.mxu1 %v4433_v43  ;;  %4019 = vmatprep.subr.mxu0 %v4433_v43 }
 0x306   :  { %v722_v61 = vpop.permute.xlu1 %721  ;;  %4007 = vmatmul.mubr.msk.f32.vlgmr.msra.gmra.mrb[8].mxu1 %vm190_vm2, %v4596_v52 }
 0x307   :  { %4012 = vmatmul.mubr.msk.f32.vlgmr.msra.gmra.mrb[4].mxu0 %vm190_vm2, %v4592_v51  ;;  %4015 = vmatpush3.xpose.msk.msra.mxu1 %vm190_vm2, %v722_v61 }
 0x308   :  { %4016 = vmatprep.mubr.msk.f32.mxu1 %vm4434_vm1, %v4433_v43  ;;  %4024 = vmatprep.subr.mxu1 %v4433_v43 }
 0x309   :  { %4021 = vmatprep.mubr.msk.f32.mxu0 %vm4434_vm1, %v4433_v43 }
 0x30a   :  { %4017 = vmatmul.mubr.msk.f32.vlgmr.msra.gmra.mrb[10].mxu1 %vm190_vm2, %v4604_v54 }
 0x30b   :  { %4026 = vmatprep.mubr.msk.f32.mxu1 %vm4434_vm1, %v4433_v43 }
 0x367   :  { %v261_v4 = vpop.f32.mrb[2].mxu1 }
 0x368   :  { %v797_v5 = vmul.f32 0.35355338, %v261_v4  ;;  %v3983_v6 = vpop.f32.mrb[3].mxu1 }
 0x36a   :  { %v817_v7 = vadd.f32 %v4662_v3, %v797_v5 }
 0x36c   :  { %v825_v9 = vsel %vm190_vm2, %v817_v7, -inf }
 0x36d   :  { %826 = vmax.xlane.f32.xlu0 %v825_v9 }
 0x36e   :  { %v337_v11 = vpop.f32.mrb[4].mxu1 }
 0x36f   :  { %v798_v12 = vmul.f32 0.35355338, %v337_v11  ;;  %v3988_v13 = vpop.f32.mrb[5].mxu1 }
 0x371   :  { %v818_v14 = vadd.f32 %v4668_v10, %v798_v12 }
 0x373   :  { %v828_v15 = vsel %vm190_vm2, %v818_v14, -inf }
 0x374   :  { %829 = vmax.xlane.f32.xlu1 %v828_v15 }
 0x3d1   :  { %v489_v16 = vpop.f32.mrb[6].mxu1 }
 0x3d2   :  { %v800_v17 = vmul.f32 0.35355338, %v489_v16  ;;  %v413_v18 = vpop.f32.mrb[0].mxu0  ;;  %v3998_v19 = vpop.f32.mrb[7].mxu1 }
 0x3d3   :  { %v799_v20 = vmul.f32 0.35355338, %v413_v18  ;;  %v3993_v21 = vpop.f32.mrb[1].mxu0 }
 0x3d4   :  { %v820_v22 = vadd.f32 %v4668_v10, %v800_v17 }
 0x3d5   :  { %v819_v25 = vadd.f32 %v4662_v3, %v799_v20 }
 0x3d6   :  { %v565_v23 = vpop.f32.mrb[2].mxu0  ;;  %v834_v24 = vsel %vm190_vm2, %v820_v22, -inf }
 0x3d7   :  { %v801_v27 = vmul.f32 0.35355338, %v565_v23  ;;  %835 = vmax.xlane.f32.xlu0 %v834_v24  ;;  %v4003_v31 = vpop.f32.mrb[3].mxu0  ;;  %v831_v36 = vsel %vm190_vm2, %v819_v25, -inf }
 0x3d9   :  { %v641_v32 = vpop.f32.mrb[8].mxu1  ;;  %v821_v37 = vadd.f32 %v4662_v3, %v801_v27 }
 0x3da   :  { %v802_v33 = vmul.f32 0.35355338, %v641_v32  ;;  %v4008_v34 = vpop.f32.mrb[9].mxu1  ;;  %v717_v35 = vpop.f32.mrb[4].mxu0 }
 0x3db   :  { %v803_v38 = vmul.f32 0.35355338, %v717_v35  ;;  %832 = vmax.xlane.f32.xlu0 %v831_v36  ;;  %v4013_v39 = vpop.f32.mrb[5].mxu0  ;;  %v837_v56 = vsel %vm190_vm2, %v821_v37, -inf }
 0x3dc   :  { %v822_v40 = vadd.f32 %v4668_v10, %v802_v33 }
 0x3dd   :  { %v793_v44 = vpop.f32.mrb[10].mxu1  ;;  %v823_v57 = vadd.f32 %v4662_v3, %v803_v38 }
 0x3de   :  { %v804_v46 = vmul.f32 0.35355338, %v793_v44  ;;  %v4018_v53 = vpop.f32.mrb[11].mxu1  ;;  %v840_v55 = vsel %vm190_vm2, %v822_v40, -inf }
 0x3df   :  { %841 = vmax.xlane.f32.xlu1 %v840_v55  ;;  %838 = vmax.xlane.f32.xlu0 %v837_v56  ;;  %v843_v60 = vsel %vm190_vm2, %v823_v57, -inf }
 0x3e0   :  { %v824_v58 = vadd.f32 %v4668_v10, %v804_v46 }
 0x3e2   :  { %v846_v59 = vsel %vm190_vm2, %v824_v58, -inf }
 0x3e3   :  { %847 = vmax.xlane.f32.xlu1 %v846_v59  ;;  %844 = vmax.xlane.f32.xlu0 %v843_v60 }
 0x3f4   :  { %989 = vrot.lane.b32.xlu1 %v4561_v45, %s4439_s1 }
 0x3f8   :  { %1065 = vrot.lane.b32.xlu1 %v4586_v49, %s4439_s1 }
 0x3f9   :  { %913 = vrot.lane.b32.xlu0 %v4564_v47, %s4439_s1 }
 0x3fa   :  { %v827_v61 = vpop.xlane.xlu0 %826 }
 0x3fb   :  { %v849_v62 = vsub.f32 %v817_v7, %v827_v61 }
 0x3fc   :  { %1141 = vrot.lane.b32.xlu1 %v4582_v48, %s4439_s1 }
 0x3fd   :  { %1217 = vrot.lane.b32.xlu0 %v4590_v50, %s4439_s1  ;;  %v857_v63 = vmul.f32 1.442695, %v849_v62 }
 0x3ff   :  { %4329 = vpow2.f32 %v857_v63 }
 0x400   :  { %1293 = vrot.lane.b32.xlu1 %v4596_v52, %s4439_s1 }
 0x401   :  { %v830_v2 = vpop.xlane.xlu1 %829 }
 0x402   :  { %v850_v45 = vsub.f32 %v818_v14, %v830_v2 }
 0x404   :  { %v859_v4 = vmul.f32 1.442695, %v850_v45 }
 0x406   :  { %4331 = vpow2.f32 %v859_v4 }
 0x409   :  { %v4696_v49 = vpop.eup %4329 }
 0x40a   :  { %v873_v47 = vsel %vm190_vm2, %v4696_v49, 0.0 }
 0x410   :  { %v4700_v48 = vpop.eup %4331 }
 0x411   :  { %v876_v50 = vsel %vm190_vm2, %v4700_v48, 0.0 }
 0x41c   :  { %874 = vadd.xlane.f32.xlu0 %v873_v47 }
 0x424   :  { %877 = vadd.xlane.f32.xlu1 %v876_v50 }
 0x464   :  { %v836_v52 = vpop.xlane.xlu0 %835 }
 0x465   :  { %v852_v5 = vsub.f32 %v820_v22, %v836_v52 }
 0x467   :  { %v863_v6 = vmul.f32 1.442695, %v852_v5 }
 0x468   :  { %v833_v7 = vpop.xlane.xlu0 %832 }
 0x469   :  { %4333 = vpow2.f32 %v863_v6  ;;  %v851_v8 = vsub.f32 %v819_v25, %v833_v7 }
 0x46b   :  { %v861_v9 = vmul.f32 1.442695, %v851_v8 }
 0x46c   :  { %v842_v11 = vpop.xlane.xlu1 %841  ;;  %v839_v12 = vpop.xlane.xlu0 %838 }
 0x46d   :  { %4335 = vpow2.f32 %v861_v9  ;;  %v854_v13 = vsub.f32 %v822_v40, %v842_v11  ;;  %v853_v14 = vsub.f32 %v821_v37, %v839_v12 }
 0x46f   :  { %v867_v15 = vmul.f32 1.442695, %v854_v13  ;;  %v865_v16 = vmul.f32 1.442695, %v853_v14 }
 0x470   :  { %v848_v17 = vpop.xlane.xlu1 %847  ;;  %v845_v18 = vpop.xlane.xlu0 %844 }
 0x471   :  { %4337 = vpow2.f32 %v867_v15  ;;  %v856_v19 = vsub.f32 %v824_v58, %v848_v17  ;;  %v855_v20 = vsub.f32 %v823_v57, %v845_v18  ;;  %v1553_v18 = vld [vmem:[%s5207_s3] sm:$0xff] }
 0x472   :  { %4339 = vpow2.f32 %v865_v16 }
 0x473   :  { %v4334_v21 = vpop.eup %4333  ;;  %v871_v22 = vmul.f32 1.442695, %v856_v19  ;;  %v869_v23 = vmul.f32 1.442695, %v855_v20  ;;  %v1554_v19 = vld [vmem:[%s5207_s3 + $0x8] sm:$0xff] }
 0x474   :  { %v990_v24 = vpop.permute.xlu1 %989  ;;  %v914_v27 = vpop.permute.xlu0 %913  ;;  %v882_v25 = vsel %vm190_vm2, %v4334_v21, 0.0  ;;  %v4240_v20 = vpack.c.bf16 %v1554_v19, %v1553_v18  ;;  %v1691_v19 = vrot.slane %v4548_v41, %v4537_v30  ;;  %v1784_v41 = vld [vmem:[%s5209_s5 + $0x18] sm:$0xff] }
 0x475   :  { %4341 = vpow2.f32 %v871_v22  ;;  %4025 = vmatpush3.msra.mxu1 %v990_v24  ;;  %883 = vadd.xlane.f32.xlu1 %v882_v25  ;;  %v1555_v22 = vld [vmem:[%s5207_s3 + $0x10] sm:$0xff] }
 0x476   :  { %4343 = vpow2.f32 %v869_v23  ;;  %4020 = vmatpush3.msra.mxu0 %v914_v27  ;;  %4034 = vmatprep.subr.mxu1 %v4433_v43  ;;  %v1556_v23 = vld [vmem:[%s5207_s3 + $0x18] sm:$0xff] }
 0x477   :  { %v4336_v31 = vpop.eup %4335  ;;  %4029 = vmatprep.subr.mxu0 %v4433_v43  ;;  %v4244_v27 = vpack.c.bf16 %v1556_v23, %v1555_v22  ;;  %v1783_v22 = vld [vmem:[%s5209_s5 + $0x10] sm:$0xff] }
 0x478   :  { %v879_v32 = vsel %vm190_vm2, %v4336_v31, 0.0  ;;  %v1066_v44 = vpop.permute.xlu1 %1065  ;;  %v1218_v46 = vpop.permute.xlu0 %1217 }
 0x479   :  { %880 = vadd.xlane.f32.xlu0 %v879_v32 }
 0x47b   :  { %v4338_v33 = vpop.eup %4337 }
 0x47c   :  { %v4340_v34 = vpop.eup %4339  ;;  %v888_v35 = vsel %vm190_vm2, %v4338_v33, 0.0  ;;  %v1142_v53 = vpop.permute.xlu1 %1141 }
 0x47d   :  { %889 = vadd.xlane.f32.xlu1 %v888_v35  ;;  %v885_v36 = vsel %vm190_vm2, %v4340_v34, 0.0 }
 0x47e   :  { %886 = vadd.xlane.f32.xlu0 %v885_v36 }
 0x47f   :  { %v4710_v37 = vpop.eup %4341 }
 0x480   :  { %v4712_v38 = vpop.eup %4343  ;;  %v894_v39 = vsel %vm190_vm2, %v4710_v37, 0.0  ;;  %v1294_v56 = vpop.permute.xlu1 %1293 }
 0x481   :  { %895 = vadd.xlane.f32.xlu1 %v894_v39  ;;  %v891_v40 = vsel %vm190_vm2, %v4712_v38, 0.0 }
 0x482   :  { %892 = vadd.xlane.f32.xlu0 %v891_v40 }
 0x492   :  { %1445 = vrot.lane.b32.xlu1 %v4604_v54, %s4439_s1 }
 0x498   :  { %1369 = vrot.lane.b32.xlu0 %v4592_v51, %s4439_s1 }
 0x4a9   :  { %v875_v55 = vpop.xlane.xlu0 %874 }
 0x4aa   :  { %4345 = vrcp.f32 %v875_v55 }
 0x4b1   :  { %v878_v57 = vpop.xlane.xlu1 %877 }
 0x4b2   :  { %4347 = vrcp.f32 %v878_v57 }
 0x4b4   :  { %v4346_v58 = vpop.eup %4345 }
 0x4b5   :  { %v905_v59 = vmul.f32 %v4346_v58, %v4696_v49 }
 0x4b7   :  { %4022 = vmatmul.mubr.msk.f32.vlgmr.msra.gmra.mrb[6].mxu0 %vm190_vm2, %v905_v59 }
 0x4b8   :  { %4030 = vmatpush3.msra.mxu0 %v1066_v44  ;;  %4031 = vmatprep.mubr.msk.f32.mxu0 %vm4434_vm1, %v4433_v43 }
 0x4b9   :  { %4039 = vmatprep.subr.mxu0 %v4433_v43 }
 0x4bc   :  { %v4348_v51 = vpop.eup %4347 }
 0x4bd   :  { %v906_v54 = vmul.f32 %v4348_v51, %v4700_v48 }
 0x4bf   :  { %4027 = vmatmul.mubr.msk.f32.vlgmr.msra.gmra.mrb[12].mxu1 %vm190_vm2, %v906_v54 }
 0x4c0   :  { %4035 = vmatpush3.msra.mxu1 %v1142_v53  ;;  %4036 = vmatprep.mubr.msk.f32.mxu1 %vm4434_vm1, %v4433_v43 }
 0x4c1   :  { %4044 = vmatprep.subr.mxu1 %v4433_v43 }
 0x502   :  { %v884_v60 = vpop.xlane.xlu1 %883 }
 0x503   :  { %4349 = vrcp.f32 %v884_v60 }
 0x506   :  { %v881_v61 = vpop.xlane.xlu0 %880 }
 0x507   :  { %4351 = vrcp.f32 %v881_v61  ;;  %v1642_v61 = vsub.s32 2, %v4526_v26 }
 0x50a   :  { %v890_v62 = vpop.xlane.xlu1 %889 }
 0x50b   :  { %4353 = vrcp.f32 %v890_v62  ;;  %v887_v63 = vpop.xlane.xlu0 %886  ;;  %v1643_v62 = vrot.slane %v4534_v29, %v1642_v61 }
 0x50c   :  { %4355 = vrcp.f32 %v887_v63 }
 0x50d   :  { %v4350_v2 = vpop.eup %4349 }
 0x50e   :  { %v908_v45 = vmul.f32 %v4350_v2, %v4334_v21  ;;  %v896_v4 = vpop.xlane.xlu1 %895 }
 0x50f   :  { %4357 = vrcp.f32 %v896_v4  ;;  %v893_v49 = vpop.xlane.xlu0 %892 }
 0x510   :  { %4359 = vrcp.f32 %v893_v49  ;;  %4037 = vmatmul.mubr.msk.f32.vlgmr.msra.gmra.mrb[14].mxu1 %vm190_vm2, %v908_v45 }
 0x511   :  { %v4352_v47 = vpop.eup %4351  ;;  %4045 = vmatpush3.msra.mxu1 %v1294_v56  ;;  %4046 = vmatprep.mubr.msk.f32.mxu1 %vm4434_vm1, %v4433_v43 }
 0x512   :  { %v907_v48 = vmul.f32 %v4352_v47, %v4336_v31  ;;  %4054 = vmatprep.subr.mxu1 %v4433_v43  ;;  %v1446_v7 = vpop.permute.xlu1 %1445 }
 0x513   :  { %v1370_v9 = vpop.permute.xlu0 %1369 }
 0x514   :  { %4032 = vmatmul.mubr.msk.f32.vlgmr.msra.gmra.mrb[8].mxu0 %vm190_vm2, %v907_v48 }
 0x515   :  { %v4354_v50 = vpop.eup %4353  ;;  %4040 = vmatpush3.msra.mxu0 %v1218_v46  ;;  %4041 = vmatprep.mubr.msk.f32.mxu0 %vm4434_vm1, %v4433_v43 }
 0x516   :  { %v4356_v52 = vpop.eup %4355  ;;  %v910_v5 = vmul.f32 %v4354_v50, %v4338_v33  ;;  %4049 = vmatprep.subr.mxu0 %v4433_v43 }
 0x517   :  { %v909_v6 = vmul.f32 %v4356_v52, %v4340_v34 }
 0x518   :  { %4047 = vmatmul.mubr.msk.f32.vlgmr.msra.gmra.mrb[16].mxu1 %vm190_vm2, %v910_v5 }
 0x519   :  { %v4358_v8 = vpop.eup %4357  ;;  %4042 = vmatmul.mubr.msk.f32.vlgmr.msra.gmra.mrb[10].mxu0 %vm190_vm2, %v909_v6  ;;  %4055 = vmatpush3.msra.mxu1 %v1446_v7 }
 0x51a   :  { %v4360_v11 = vpop.eup %4359  ;;  %v912_v12 = vmul.f32 %v4358_v8, %v4710_v37  ;;  %4050 = vmatpush3.msra.mxu0 %v1370_v9  ;;  %4051 = vmatprep.mubr.msk.f32.mxu0 %vm4434_vm1, %v4433_v43 }
 0x51b   :  { %v911_v13 = vmul.f32 %v4360_v11, %v4712_v38  ;;  %4056 = vmatprep.mubr.msk.f32.mxu1 %vm4434_vm1, %v4433_v43  ;;  %4241 = vmatprep.subr.bf16.mxu0 %v4240_v20 }
 0x51c   :  { %4057 = vmatmul.mubr.msk.f32.vlgmr.msra.gmra.mrb[18].mxu1 %vm190_vm2, %v912_v12 }
 0x51d   :  { %4052 = vmatmul.mubr.msk.f32.vlgmr.msra.gmra.mrb[12].mxu0 %vm190_vm2, %v911_v13  ;;  %v1684_v13 = vld [vmem:[%s5208_s4] sm:$0xff] }
 0x51e   :  { %4243 = vmatpush3.bf16.msra.mxu0 %v4240_v20  ;;  %v1781_v20 = vld [vmem:[%s5209_s5] sm:$0xff] }
 0x51f   :  { %4245 = vmatprep.subr.bf16.mxu0 %v4244_v27 }
 0x522   :  { %4247 = vmatpush3.bf16.msra.mxu0 %v4244_v27  ;;  %v1785_v27 = vld [vmem:[%s5209_s5 + $0x20] sm:$0xff] }
 0x58a   :  { %v985_v14 = vpop.f32.mrb[6].mxu0 }
 0x58b   :  { %v4023_v15 = vpop.f32.mrb[7].mxu0 }
 0x592   :  { %v1061_v16 = vpop.f32.mrb[12].mxu1 }
 0x593   :  { %v4028_v17 = vpop.f32.mrb[13].mxu1 }
 0x594   :  { %v1687_v17 = vld [vmem:[%s5208_s4 + $0x18] sm:$0xff] }
 0x5e3   :  { %v1213_v21 = vpop.f32.mrb[14].mxu1 }
 0x5e4   :  { %v4038_v24 = vpop.f32.mrb[15].mxu1  ;;  %1539 = vrot.lane.b32.xlu0 %v1213_v21, %s4440_s18  ;;  %v1782_v21 = vld [vmem:[%s5209_s5 + $0x8] sm:$0xff] }
 0x5e5   :  { %v4256_v23 = vpack.c.bf16 %v1782_v21, %v1781_v20  ;;  %v4260_v24 = vpack.c.bf16 %v1784_v41, %v1783_v22  ;;  %v3796_v22 = vld [vmem:[%s5206_s2 + $0x20] sm:$0xff] }
 0x5e7   :  { %v1137_v25 = vpop.f32.mrb[8].mxu0  ;;  %4257 = vmatprep.subr.bf16.mxu0 %v4256_v23 }
 0x5e8   :  { %1522 = vrot.lane.b32.xlu0 %v1137_v25, %s4440_s18  ;;  %v4033_v31 = vpop.f32.mrb[9].mxu0  ;;  %v1786_v25 = vld [vmem:[%s5209_s5 + $0x28] sm:$0xff] }
 0x5eb   :  { %v1365_v32 = vpop.f32.mrb[16].mxu1 }
 0x5ec   :  { %v1289_v33 = vpop.f32.mrb[10].mxu0  ;;  %v4048_v34 = vpop.f32.mrb[17].mxu1  ;;  %1543 = vrot.lane.b32.xlu0 %v1365_v32, %s4441_s19 }
 0x5ed   :  { %1526 = vrot.lane.b32.xlu1 %v1289_v33, %s4441_s19  ;;  %v4043_v35 = vpop.f32.mrb[11].mxu0 }
 0x5ef   :  { %v1517_v36 = vpop.f32.mrb[18].mxu1 }
 0x5f0   :  { %v1441_v37 = vpop.f32.mrb[12].mxu0  ;;  %v4058_v38 = vpop.f32.mrb[19].mxu1 }
 0x5f1   :  { %1530 = vrot.lane.b32.xlu1 %v1441_v37, %s4442_s20  ;;  %v4053_v39 = vpop.f32.mrb[13].mxu0  ;;  %v1674_v37 = vsub.s32 3, %v4526_v26  ;;  %v1680_v38 = vsub.s32 4, %v4526_v26 }
 0x5f3   :  { %v1675_v39 = vrot.slane %v4534_v29, %v1674_v37 }
 0x5f5   :  { %1547 = vrot.lane.b32.xlu1 %v1517_v36, %s4442_s20 }
 0x656   :  { %v1540_v40 = vpop.permute.xlu0 %1539 }
 0x657   :  { %v1550_v59 = vsel %vm190_vm2, %v1061_v16, %v1540_v40  ;;  %v1686_v16 = vld [vmem:[%s5208_s4 + $0x10] sm:$0xff] }
 0x658   :  { %v4252_v18 = vpack.c.bf16 %v1687_v17, %v1686_v16 }
 0x65a   :  { %v1523_v44 = vpop.permute.xlu0 %1522 }
 0x65b   :  { %v1533_v53 = vsel %vm190_vm2, %v985_v14, %v1523_v44  ;;  %v1685_v14 = vld [vmem:[%s5208_s4 + $0x8] sm:$0xff] }
 0x65c   :  { %v4248_v15 = vpack.c.bf16 %v1685_v14, %v1684_v13 }
 0x65e   :  { %v1544_v57 = vpop.permute.xlu0 %1543  ;;  %4249 = vmatprep.subr.bf16.mxu1 %v4248_v15 }
 0x65f   :  { %v1527_v46 = vpop.permute.xlu1 %1526  ;;  %v1551_v51 = vsel %vm1534_vm5, %v1550_v59, %v1544_v57  ;;  %4251 = vmatpush3.bf16.msra.mxu1 %v4248_v15 }
 0x660   :  { %v1535_v55 = vsel %vm1534_vm5, %v1533_v53, %v1527_v46  ;;  %4253 = vmatprep.subr.bf16.mxu1 %v4252_v18  ;;  %v1681_v46 = vrot.slane %v4534_v29, %v1680_v38 }
 0x663   :  { %v1531_v56 = vpop.permute.xlu1 %1530  ;;  %4255 = vmatpush3.bf16.msra.mxu1 %v4252_v18 }
 0x664   :  { %v1537_v58 = vsel %vm1536_vm6, %v1535_v55, %v1531_v56 }
 0x665   :  { %4067 = vmatprep.mubr.msk.f32.mxu0 %vm43_vm0, %v1537_v58 }
 0x667   :  { %v1548_v54 = vpop.permute.xlu1 %1547 }
 0x668   :  { %v1552_v60 = vsel %vm1536_vm6, %v1551_v51, %v1548_v54  ;;  %v1787_v51 = vld [vmem:[%s5209_s5 + $0x30] sm:$0xff]  ;;  %v1788_v54 = vld [vmem:[%s5209_s5 + $0x38] sm:$0xff] }
 0x669   :  { %4068 = vmatmul.mubr.msk.f32.vlgmr.msra.gmra.mrb[14].mxu0 %vm43_vm0, %v1552_v60  ;;  %v4268_v60 = vpack.c.bf16 %v1788_v54, %v1787_v51  ;;  %v4898_v51 = vld [vmem:[%s5210_s6 + $0x2] sm:$0x3] }
 0x66a   :  { %4259 = vmatpush3.bf16.msra.mxu0 %v4256_v23  ;;  %v3797_v23 = vld [vmem:[%s5206_s2 + $0x28] sm:$0xff]  ;;  %v4902_v54 = vrot.slane %v4898_v51, %v4529_v28 }
 0x66b   :  { %4261 = vmatprep.subr.bf16.mxu0 %v4260_v24  ;;  %v4272_v41 = vpack.c.bf16 %v3797_v23, %v3796_v22 }
 0x66d   :  { %4273 = vmatprep.subr.bf16.mxu1 %v4272_v41 }
 0x66e   :  { %4263 = vmatpush3.bf16.msra.mxu0 %v4260_v24  ;;  %v3798_v24 = vld [vmem:[%s5206_s2 + $0x30] sm:$0xff] }
 0x73c   :  { %v4069_v63 = vpop.f32.mrb[14].mxu0 }
 0x73d   :  { %v1639_v2 = vadd.f32 %v4069_v63, %v4504_v1  ;;  %v1629_v45 = vpop.f32.mrb[15].mxu0 }
 0x73e   :  { %v1638_v4 = vadd.f32 %v1629_v45, %v4499_v0 }
 0x73f   :  { %v4782_v49 = vadd.f32 %v1643_v62, %v1639_v2 }
 0x740   :  { %v4784_v47 = vadd.f32 %v1643_v62, %v1638_v4 }
 0x741   :  { %v1649_v48 = vsel %vm43_vm0, %v4782_v49, 0.0 }
 0x742   :  { %1650 = vadd.xlane.f32.xlu1 %v1649_v48  ;;  %v1646_v50 = vsel %vm43_vm0, %v4784_v47, 0.0 }
 0x743   :  { %1647 = vadd.xlane.f32.xlu0 %v1646_v50 }
 0x753   :  { %1694 = vrot.lane.b32.xlu1 %v1691_v19, %s4443_s17 }
 0x7cf   :  { %v1651_v52 = vpop.xlane.xlu1 %1650 }
 0x7d0   :  { %v1653_v5 = vmul.f32 0.03125, %v1651_v52  ;;  %v1648_v6 = vpop.xlane.xlu0 %1647 }
 0x7d1   :  { %v1652_v7 = vmul.f32 0.03125, %v1648_v6  ;;  %v1875_v6 = vsub.s32 5, %v4526_v26 }
 0x7d2   :  { %v1655_v1 = vsub.f32 %v4782_v49, %v1653_v5 }
 0x7d3   :  { %v1654_v0 = vsub.f32 %v4784_v47, %v1652_v7  ;;  %v1695_v62 = vpop.permute.xlu1 %1694  ;;  %v1876_v7 = vrot.slane %v4534_v29, %v1875_v6 }
 0x7d4   :  { %v1657_v11 = vmul.f32 %v1655_v1, %v1655_v1 }
 0x7d5   :  { %v1656_v8 = vmul.f32 %v1654_v0, %v1654_v0 }
 0x7d6   :  { %v1661_v12 = vsel %vm43_vm0, %v1657_v11, 0.0 }
 0x7d7   :  { %v1658_v9 = vsel %vm43_vm0, %v1656_v8, 0.0 }
 0x7d8   :  { %1659 = vadd.xlane.f32.xlu0 %v1658_v9 }
 0x7dc   :  { %1662 = vadd.xlane.f32.xlu0 %v1661_v12 }
 0x7f2   :  { %1692 = vrot.lane.b32.xlu0 %v4552_v42, %s4443_s17  ;;  %v4264_v42 = vpack.c.bf16 %v1786_v25, %v1785_v27  ;;  %v3799_v27 = vld [vmem:[%s5206_s2 + $0x38] sm:$0xff] }
 0x7f3   :  { %v4276_v25 = vpack.c.bf16 %v3799_v27, %v3798_v24 }
 0x7f4   :  { %4265 = vmatprep.subr.bf16.mxu0 %v4264_v42 }
 0x7f5   :  { %4267 = vmatpush3.bf16.msra.mxu0 %v4264_v42 }
 0x7f6   :  { %4269 = vmatprep.subr.bf16.mxu0 %v4268_v60 }
 0x7f9   :  { %4271 = vmatpush3.bf16.msra.mxu0 %v4268_v60 }
 0x7fa   :  { %4121 = vmatprep.subr.mxu0 %v4433_v43 }
 0x865   :  { %v1660_v31 = vpop.xlane.xlu0 %1659 }
 0x866   :  { %v1664_v32 = vmul.f32 0.03125, %v1660_v31 }
 0x868   :  { %v1666_v33 = vadd.f32 1e-05, %v1664_v32 }
 0x869   :  { %v1663_v34 = vpop.xlane.xlu0 %1662 }
 0x86a   :  { %4361 = vrsqrt.f32 %v1666_v33  ;;  %v1665_v35 = vmul.f32 0.03125, %v1663_v34 }
 0x86c   :  { %v1667_v36 = vadd.f32 1e-05, %v1665_v35 }
 0x86d   :  { %v1693_v63 = vpop.permute.xlu0 %1692 }
 0x86e   :  { %4363 = vrsqrt.f32 %v1667_v36  ;;  %v1696_v2 = vsel %vm43_vm0, %v1693_v63, %v1695_v62  ;;  %v4885_v36 = vld [vmem:[%s5211_s7 + $0x8] sm:$0x3f] }
 0x874   :  { %v4362_v40 = vpop.eup %4361 }
 0x875   :  { %v1670_v44 = vmul.f32 %v4362_v40, %v1654_v0 }
 0x877   :  { %v1676_v53 = vmul.f32 %v1675_v39, %v1670_v44 }
 0x878   :  { %v4364_v55 = vpop.eup %4363 }
 0x879   :  { %v1671_v56 = vmul.f32 %v4364_v55, %v1655_v1  ;;  %v1682_v57 = vadd.f32 %v1681_v46, %v1676_v53  ;;  %v1918_v55 = vrot.slane %v4885_v36, %v4537_v30 }
 0x87b   :  { %v1677_v58 = vmul.f32 %v1675_v39, %v1671_v56  ;;  %4078 = vmatprep.mubr.msk.f32.mxu1 %vm43_vm0, %v1682_v57  ;;  %v1912_v39 = vrot.slane %v4885_v36, %v4529_v28 }
 0x87d   :  { %v1683_v59 = vadd.f32 %v1681_v46, %v1677_v58 }
 0x87f   :  { %4079 = vmatmul.mubr.msk.f32.vlgmr.msra.gmra.mrb[20].mxu1 %vm43_vm0, %v1683_v59 }
 0x880   :  { %4275 = vmatpush3.bf16.msra.mxu1 %v4272_v41 }
 0x881   :  { %4277 = vmatprep.subr.bf16.mxu1 %v4276_v25 }
 0x884   :  { %4279 = vmatpush3.bf16.msra.mxu1 %v4276_v25 }
 0x885   :  { %4111 = vmatprep.subr.mxu1 %v4433_v43 }
 0x952   :  { %v4080_v45 = vpop.f32.mrb[20].mxu1 }
 0x953   :  { %v1776_v4 = vadd.f32 %v4080_v45, %v1696_v2  ;;  %v1770_v48 = vpop.f32.mrb[21].mxu1 }
 0x954   :  { %v1771_v50 = vadd.f32 %v1770_v48, %v1696_v2 }
 0x955   :  { %v1780_v5 = vmax.f32 %v1776_v4, 0.0 }
 0x956   :  { %v1779_v52 = vmax.f32 %v1771_v50, 0.0 }
 0x958   :  { %4097 = vmatprep.mubr.msk.f32.mxu0 %vm1789_vm7, %v1779_v52 }
 0x959   :  { %4098 = vmatmul.mubr.msk.f32.vlgmr.msra.gmra.mrb[16].mxu0 %vm1789_vm7, %v1780_v5 }
 0x95a   :  { %4123 = vmatprep.mubr.msk.f32.mxu0 %vm4434_vm1, %v4433_v43 }
 0xa2c   :  { %v4099_v1 = vpop.f32.mrb[16].mxu0 }
 0xa2d   :  { %v1872_v0 = vadd.f32 %v4099_v1, %v4782_v49  ;;  %v1862_v8 = vpop.f32.mrb[17].mxu0 }
 0xa2e   :  { %v1871_v9 = vadd.f32 %v1862_v8, %v4784_v47 }
 0xa2f   :  { %v4857_v11 = vadd.f32 %v1876_v7, %v1872_v0 }
 0xa30   :  { %v4859_v12 = vadd.f32 %v1876_v7, %v1871_v9 }
 0xa31   :  { %v1886_v13 = vsel %vm43_vm0, %v4857_v11, 0.0 }
 0xa32   :  { %1887 = vadd.xlane.f32.xlu0 %v1886_v13  ;;  %v1883_v14 = vsel %vm43_vm0, %v4859_v12, 0.0 }
 0xa33   :  { %1884 = vadd.xlane.f32.xlu1 %v1883_v14 }
 0xabf   :  { %v1888_v15 = vpop.xlane.xlu0 %1887 }
 0xac0   :  { %v1890_v29 = vmul.f32 0.03125, %v1888_v15  ;;  %v1885_v16 = vpop.xlane.xlu1 %1884 }
 0xac1   :  { %v1889_v17 = vmul.f32 0.03125, %v1885_v16 }
 0xac2   :  { %v1892_v49 = vsub.f32 %v4857_v11, %v1890_v29 }
 0xac3   :  { %v1891_v47 = vsub.f32 %v4859_v12, %v1889_v17 }
 0xac4   :  { %v1894_v18 = vmul.f32 %v1892_v49, %v1892_v49 }
 0xac5   :  { %v1893_v19 = vmul.f32 %v1891_v47, %v1891_v47 }
 0xac6   :  { %v1898_v20 = vsel %vm43_vm0, %v1894_v18, 0.0 }
 0xac7   :  { %1899 = vadd.xlane.f32.xlu1 %v1898_v20  ;;  %v1895_v21 = vsel %vm43_vm0, %v1893_v19, 0.0 }
 0xac8   :  { %1896 = vadd.xlane.f32.xlu0 %v1895_v21 }
 0xb54   :  { %v1900_v42 = vpop.xlane.xlu1 %1899 }
 0xb55   :  { %v1902_v31 = vmul.f32 0.03125, %v1900_v42  ;;  %v1897_v32 = vpop.xlane.xlu0 %1896 }
 0xb56   :  { %v1901_v33 = vmul.f32 0.03125, %v1897_v32 }
 0xb57   :  { %v1904_v34 = vadd.f32 1e-05, %v1902_v31 }
 0xb58   :  { %v1903_v35 = vadd.f32 1e-05, %v1901_v33 }
 0xb59   :  { %4365 = vrsqrt.f32 %v1904_v34 }
 0xb5a   :  { %4367 = vrsqrt.f32 %v1903_v35 }
 0xb63   :  { %v4366_v40 = vpop.eup %4365 }
 0xb64   :  { %v4368_v44 = vpop.eup %4367  ;;  %v1908_v46 = vmul.f32 %v4366_v40, %v1892_v49 }
 0xb65   :  { %v1907_v53 = vmul.f32 %v4368_v44, %v1891_v47 }
 0xb66   :  { %v1914_v56 = vmul.f32 %v1912_v39, %v1908_v46 }
 0xb67   :  { %v1913_v57 = vmul.f32 %v1912_v39, %v1907_v53 }
 0xb68   :  { %v1920_v59 = vadd.f32 %v1918_v55, %v1914_v56 }
 0xb69   :  { %v1919_v58 = vadd.f32 %v1918_v55, %v1913_v57 }
 0xb6b   :  { %4108 = vmatprep.mubr.msk.f32.mxu1 %vm43_vm0, %v1919_v58 }
 0xb6c   :  { %4109 = vmatmul.mubr.msk.f32.vlgmr.msra.gmra.mrb[22].mxu1 %vm43_vm0, %v1920_v59 }
 0xb6d   :  { %4113 = vmatprep.mubr.msk.f32.mxu1 %vm4434_vm1, %v4433_v43 }
 0xc3f   :  { %v4110_v60 = vpop.f32.mrb[22].mxu1 }
 0xc40   :  { %v4905_v62 = vadd.f32 %v4110_v60, %v4902_v54  ;;  %v2004_v63 = vpop.f32.mrb[23].mxu1 }
 0xc41   :  { %v4908_v2 = vadd.f32 %v2004_v63, %v4902_v54 }
 0xc42   :  { %2017 = vrot.lane.b32.xlu1 %v4905_v62, %s4435_s24 }
 0xc43   :  { %2014 = vrot.lane.b32.xlu0 %v4908_v2, %s4435_s24 }
 0xc46   :  { %2019 = vrot.lane.b32.xlu1 %v4908_v2, %s4436_s25 }
 0xc47   :  { %2023 = vrot.lane.b32.xlu0 %v4908_v2, %s4437_s26 }
 0xc4a   :  { %2021 = vrot.lane.b32.xlu1 %v4905_v62, %s4436_s25 }
 0xc4b   :  { %2027 = vrot.lane.b32.xlu0 %v4908_v2, %s4438_s27 }
 0xc4e   :  { %2025 = vrot.lane.b32.xlu1 %v4905_v62, %s4437_s26 }
 0xc52   :  { %2103 = vrot.lane.b32.xlu1 %v4905_v62, %s4438_s27 }
 0xcb4   :  { %v4926_v45 = vpop.permute.xlu1 %2017 }
 0xcb5   :  { %2255 = vrot.lane.b32.xlu1 %v4926_v45, %s4438_s27  ;;  %v4930_v4 = vpop.permute.xlu0 %2014 }
 0xcb6   :  { %2179 = vrot.lane.b32.xlu0 %v4930_v4, %s4438_s27 }
 0xcb8   :  { %v4934_v48 = vpop.permute.xlu1 %2019 }
 0xcb9   :  { %v4936_v50 = vpop.permute.xlu0 %2023 }
 0xcba   :  { %2331 = vrot.lane.b32.xlu0 %v4934_v48, %s4438_s27 }
 0xcbc   :  { %v4940_v52 = vpop.permute.xlu1 %2021 }
 0xcbd   :  { %2407 = vrot.lane.b32.xlu1 %v4940_v52, %s4438_s27  ;;  %v2028_v5 = vpop.permute.xlu0 %2027 }
 0xcbe   :  { %2483 = vrot.lane.b32.xlu0 %v4936_v50, %s4438_s27  ;;  %4112 = vmatpush3.xpose.msk.msra.mxu1 %vm190_vm2, %v2028_v5 }
 0xcbf   :  { %4116 = vmatprep.subr.mxu1 %v4433_v43 }
 0xcc0   :  { %v4948_v7 = vpop.permute.xlu1 %2025 }
 0xcc1   :  { %2559 = vrot.lane.b32.xlu1 %v4948_v7, %s4438_s27  ;;  %4114 = vmatmul.mubr.msk.f32.vlgmr.msra.gmra.mrb[24].mxu1 %vm190_vm2, %v4908_v2 }
 0xcc2   :  { %4118 = vmatprep.mubr.msk.f32.mxu1 %vm4434_vm1, %v4433_v43 }
 0xcc4   :  { %v2104_v1 = vpop.permute.xlu1 %2103 }
 0xcc5   :  { %4117 = vmatpush3.xpose.msk.msra.mxu1 %vm190_vm2, %v2104_v1 }
 0xcc6   :  { %4126 = vmatprep.subr.mxu1 %v4433_v43 }
 0xcc8   :  { %4119 = vmatmul.mubr.msk.f32.vlgmr.msra.gmra.mrb[26].mxu1 %vm190_vm2, %v4905_v62 }
 0xcc9   :  { %4128 = vmatprep.mubr.msk.f32.mxu1 %vm4434_vm1, %v4433_v43 }
 0xd27   :  { %v2256_v0 = vpop.permute.xlu1 %2255 }
 0xd28   :  { %4127 = vmatpush3.xpose.msk.msra.mxu1 %vm190_vm2, %v2256_v0  ;;  %v2180_v8 = vpop.permute.xlu0 %2179 }
 0xd29   :  { %4122 = vmatpush3.xpose.msk.msra.mxu0 %vm190_vm2, %v2180_v8  ;;  %4136 = vmatprep.subr.mxu1 %v4433_v43 }
 0xd2a   :  { %4131 = vmatprep.subr.mxu0 %v4433_v43 }
 0xd2b   :  { %4129 = vmatmul.mubr.msk.f32.vlgmr.msra.gmra.mrb[28].mxu1 %vm190_vm2, %v4926_v45 }
 0xd2c   :  { %4124 = vmatmul.mubr.msk.f32.vlgmr.msra.gmra.mrb[18].mxu0 %vm190_vm2, %v4930_v4  ;;  %v2332_v9 = vpop.permute.xlu0 %2331  ;;  %4138 = vmatprep.mubr.msk.f32.mxu1 %vm4434_vm1, %v4433_v43 }
 0xd2d   :  { %4132 = vmatpush3.xpose.msk.msra.mxu0 %vm190_vm2, %v2332_v9  ;;  %4133 = vmatprep.mubr.msk.f32.mxu0 %vm4434_vm1, %v4433_v43 }
 0xd2e   :  { %4141 = vmatprep.subr.mxu0 %v4433_v43 }
 0xd2f   :  { %v2408_v13 = vpop.permute.xlu1 %2407 }
 0xd30   :  { %4134 = vmatmul.mubr.msk.f32.vlgmr.msra.gmra.mrb[20].mxu0 %vm190_vm2, %v4934_v48  ;;  %4137 = vmatpush3.xpose.msk.msra.mxu1 %vm190_vm2, %v2408_v13  ;;  %v2484_v14 = vpop.permute.xlu0 %2483 }
 0xd31   :  { %4142 = vmatpush3.xpose.msk.msra.mxu0 %vm190_vm2, %v2484_v14  ;;  %4143 = vmatprep.mubr.msk.f32.mxu0 %vm4434_vm1, %v4433_v43 }
 0xd32   :  { %4146 = vmatprep.subr.mxu1 %v4433_v43  ;;  %4151 = vmatprep.subr.mxu0 %v4433_v43 }
 0xd33   :  { %v2560_v15 = vpop.permute.xlu1 %2559  ;;  %4139 = vmatmul.mubr.msk.f32.vlgmr.msra.gmra.mrb[30].mxu1 %vm190_vm2, %v4940_v52 }
 0xd34   :  { %4144 = vmatmul.mubr.msk.f32.vlgmr.msra.gmra.mrb[22].mxu0 %vm190_vm2, %v4936_v50  ;;  %4147 = vmatpush3.xpose.msk.msra.mxu1 %vm190_vm2, %v2560_v15 }
 0xd35   :  { %4148 = vmatprep.mubr.msk.f32.mxu1 %vm4434_vm1, %v4433_v43  ;;  %4156 = vmatprep.subr.mxu1 %v4433_v43 }
 0xd36   :  { %4153 = vmatprep.mubr.msk.f32.mxu0 %vm4434_vm1, %v4433_v43 }
 0xd37   :  { %4149 = vmatmul.mubr.msk.f32.vlgmr.msra.gmra.mrb[32].mxu1 %vm190_vm2, %v4948_v7 }
 0xd38   :  { %4158 = vmatprep.mubr.msk.f32.mxu1 %vm4434_vm1, %v4433_v43 }
 0xd94   :  { %v2099_v29 = vpop.f32.mrb[24].mxu1 }
 0xd95   :  { %v2635_v16 = vmul.f32 0.35355338, %v2099_v29  ;;  %v4115_v17 = vpop.f32.mrb[25].mxu1 }
 0xd97   :  { %v2643_v49 = vadd.f32 %v2635_v16, %v4662_v3 }
 0xd99   :  { %v2651_v47 = vsel %vm190_vm2, %v2643_v49, -inf }
 0xd9a   :  { %2652 = vmax.xlane.f32.xlu0 %v2651_v47 }
 0xd9b   :  { %v2175_v18 = vpop.f32.mrb[26].mxu1 }
 0xd9c   :  { %v2636_v19 = vmul.f32 0.35355338, %v2175_v18  ;;  %v4120_v20 = vpop.f32.mrb[27].mxu1 }
 0xd9e   :  { %v2644_v21 = vadd.f32 %v2636_v19, %v4668_v10 }
 0xda0   :  { %v2654_v22 = vsel %vm190_vm2, %v2644_v21, -inf }
 0xda1   :  { %2655 = vmax.xlane.f32.xlu1 %v2654_v22 }
 0xdfe   :  { %v2327_v23 = vpop.f32.mrb[28].mxu1 }
 0xdff   :  { %v2638_v41 = vmul.f32 0.35355338, %v2327_v23  ;;  %v2251_v24 = vpop.f32.mrb[18].mxu0  ;;  %v4130_v27 = vpop.f32.mrb[29].mxu1 }
 0xe00   :  { %v2637_v25 = vmul.f32 0.35355338, %v2251_v24  ;;  %v4125_v42 = vpop.f32.mrb[19].mxu0 }
 0xe01   :  { %v2646_v31 = vadd.f32 %v2638_v41, %v4668_v10 }
 0xe02   :  { %v2645_v34 = vadd.f32 %v2637_v25, %v4662_v3 }
 0xe03   :  { %v2403_v32 = vpop.f32.mrb[20].mxu0  ;;  %v2660_v33 = vsel %vm190_vm2, %v2646_v31, -inf }
 0xe04   :  { %v2639_v35 = vmul.f32 0.35355338, %v2403_v32  ;;  %2661 = vmax.xlane.f32.xlu0 %v2660_v33  ;;  %v4135_v39 = vpop.f32.mrb[21].mxu0  ;;  %v2657_v55 = vsel %vm190_vm2, %v2645_v34, -inf }
 0xe06   :  { %v2479_v40 = vpop.f32.mrb[30].mxu1  ;;  %v2647_v56 = vadd.f32 %v2639_v35, %v4662_v3 }
 0xe07   :  { %v2640_v44 = vmul.f32 0.35355338, %v2479_v40  ;;  %v4140_v46 = vpop.f32.mrb[31].mxu1  ;;  %v2555_v53 = vpop.f32.mrb[22].mxu0 }
 0xe08   :  { %v2641_v57 = vmul.f32 0.35355338, %v2555_v53  ;;  %2658 = vmax.xlane.f32.xlu0 %v2657_v55  ;;  %v4145_v58 = vpop.f32.mrb[23].mxu0  ;;  %v2663_v0 = vsel %vm190_vm2, %v2647_v56, -inf }
 0xe09   :  { %v2648_v59 = vadd.f32 %v2640_v44, %v4668_v10 }
 0xe0a   :  { %v2631_v60 = vpop.f32.mrb[32].mxu1  ;;  %v2649_v8 = vadd.f32 %v2641_v57, %v4662_v3 }
 0xe0b   :  { %v2642_v63 = vmul.f32 0.35355338, %v2631_v60  ;;  %v4150_v5 = vpop.f32.mrb[33].mxu1  ;;  %v2666_v1 = vsel %vm190_vm2, %v2648_v59, -inf }
 0xe0c   :  { %2667 = vmax.xlane.f32.xlu1 %v2666_v1  ;;  %2664 = vmax.xlane.f32.xlu0 %v2663_v0  ;;  %v2669_v14 = vsel %vm190_vm2, %v2649_v8, -inf }
 0xe0d   :  { %v2650_v9 = vadd.f32 %v2642_v63, %v4668_v10 }
 0xe0f   :  { %v2672_v13 = vsel %vm190_vm2, %v2650_v9, -inf }
 0xe10   :  { %2673 = vmax.xlane.f32.xlu1 %v2672_v13  ;;  %2670 = vmax.xlane.f32.xlu0 %v2669_v14 }
 0xe21   :  { %2815 = vrot.lane.b32.xlu1 %v4905_v62, %s4439_s1 }
 0xe25   :  { %2891 = vrot.lane.b32.xlu1 %v4930_v4, %s4439_s1 }
 0xe26   :  { %2739 = vrot.lane.b32.xlu0 %v4908_v2, %s4439_s1 }
 0xe27   :  { %v2653_v3 = vpop.xlane.xlu0 %2652 }
 0xe28   :  { %v2675_v10 = vsub.f32 %v2643_v49, %v2653_v3 }
 0xe29   :  { %2967 = vrot.lane.b32.xlu1 %v4926_v45, %s4439_s1 }
 0xe2a   :  { %3043 = vrot.lane.b32.xlu0 %v4934_v48, %s4439_s1  ;;  %v2683_v15 = vmul.f32 1.442695, %v2675_v10 }
 0xe2c   :  { %4369 = vpow2.f32 %v2683_v15 }
 0xe2d   :  { %3119 = vrot.lane.b32.xlu1 %v4940_v52, %s4439_s1 }
 0xe2e   :  { %v2656_v29 = vpop.xlane.xlu1 %2655 }
 0xe2f   :  { %v2676_v62 = vsub.f32 %v2644_v21, %v2656_v29 }
 0xe31   :  { %v2685_v16 = vmul.f32 1.442695, %v2676_v62 }
 0xe33   :  { %4371 = vpow2.f32 %v2685_v16 }
 0xe36   :  { %v5026_v4 = vpop.eup %4369 }
 0xe37   :  { %v2699_v2 = vsel %vm190_vm2, %v5026_v4, 0.0 }
 0xe3d   :  { %v5030_v45 = vpop.eup %4371 }
 0xe3e   :  { %v2702_v48 = vsel %vm190_vm2, %v5030_v45, 0.0 }
 0xe49   :  { %2700 = vadd.xlane.f32.xlu0 %v2699_v2 }
 0xe51   :  { %2703 = vadd.xlane.f32.xlu1 %v2702_v48 }
 0xe91   :  { %v2662_v52 = vpop.xlane.xlu0 %2661 }
 0xe92   :  { %v2678_v17 = vsub.f32 %v2646_v31, %v2662_v52 }
 0xe94   :  { %v2689_v49 = vmul.f32 1.442695, %v2678_v17 }
 0xe95   :  { %v2659_v47 = vpop.xlane.xlu0 %2658 }
 0xe96   :  { %4373 = vpow2.f32 %v2689_v49  ;;  %v2677_v18 = vsub.f32 %v2645_v34, %v2659_v47 }
 0xe98   :  { %v2687_v19 = vmul.f32 1.442695, %v2677_v18 }
 0xe99   :  { %v2668_v20 = vpop.xlane.xlu1 %2667  ;;  %v2665_v21 = vpop.xlane.xlu0 %2664 }
 0xe9a   :  { %4375 = vpow2.f32 %v2687_v19  ;;  %v2680_v22 = vsub.f32 %v2648_v59, %v2668_v20  ;;  %v2679_v23 = vsub.f32 %v2647_v56, %v2665_v21 }
 0xe9c   :  { %v2693_v41 = vmul.f32 1.442695, %v2680_v22  ;;  %v2691_v24 = vmul.f32 1.442695, %v2679_v23 }
 0xe9d   :  { %v2674_v27 = vpop.xlane.xlu1 %2673  ;;  %v2671_v25 = vpop.xlane.xlu0 %2670 }
 0xe9e   :  { %4377 = vpow2.f32 %v2693_v41  ;;  %v2682_v42 = vsub.f32 %v2650_v9, %v2674_v27  ;;  %v2681_v32 = vsub.f32 %v2649_v8, %v2671_v25 }
 0xe9f   :  { %4379 = vpow2.f32 %v2691_v24 }
 0xea0   :  { %v4374_v33 = vpop.eup %4373  ;;  %v2697_v31 = vmul.f32 1.442695, %v2682_v42  ;;  %v2695_v35 = vmul.f32 1.442695, %v2681_v32  ;;  %v3826_v32 = vld [vmem:[%s5207_s3 + $0x20] sm:$0xff] }
 0xea1   :  { %v2816_v39 = vpop.permute.xlu1 %2815  ;;  %v2740_v40 = vpop.permute.xlu0 %2739  ;;  %v2708_v34 = vsel %vm190_vm2, %v4374_v33, 0.0 }
 0xea2   :  { %4381 = vpow2.f32 %v2697_v31  ;;  %4157 = vmatpush3.msra.mxu1 %v2816_v39  ;;  %2709 = vadd.xlane.f32.xlu1 %v2708_v34  ;;  %v3829_v39 = vld [vmem:[%s5207_s3 + $0x38] sm:$0xff] }
 0xea3   :  { %4383 = vpow2.f32 %v2695_v35  ;;  %4152 = vmatpush3.msra.mxu0 %v2740_v40  ;;  %4166 = vmatprep.subr.mxu1 %v4433_v43 }
 0xea4   :  { %v4376_v44 = vpop.eup %4375  ;;  %4161 = vmatprep.subr.mxu0 %v4433_v43 }
 0xea5   :  { %v2705_v46 = vsel %vm190_vm2, %v4376_v44, 0.0  ;;  %v2892_v5 = vpop.permute.xlu1 %2891  ;;  %v3044_v1 = vpop.permute.xlu0 %3043 }
 0xea6   :  { %2706 = vadd.xlane.f32.xlu0 %v2705_v46 }
 0xea8   :  { %v4378_v53 = vpop.eup %4377 }
 0xea9   :  { %v4380_v55 = vpop.eup %4379  ;;  %v2714_v56 = vsel %vm190_vm2, %v4378_v53, 0.0  ;;  %v2968_v0 = vpop.permute.xlu1 %2967 }
 0xeaa   :  { %2715 = vadd.xlane.f32.xlu1 %v2714_v56  ;;  %v2711_v57 = vsel %vm190_vm2, %v4380_v55, 0.0 }
 0xeab   :  { %2712 = vadd.xlane.f32.xlu0 %v2711_v57 }
 0xeac   :  { %v5040_v58 = vpop.eup %4381 }
 0xead   :  { %v5042_v59 = vpop.eup %4383  ;;  %v2720_v60 = vsel %vm190_vm2, %v5040_v58, 0.0  ;;  %v3120_v9 = vpop.permute.xlu1 %3119 }
 0xeae   :  { %2721 = vadd.xlane.f32.xlu1 %v2720_v60  ;;  %v2717_v63 = vsel %vm190_vm2, %v5042_v59, 0.0 }
 0xeaf   :  { %2718 = vadd.xlane.f32.xlu0 %v2717_v63 }
 0xebf   :  { %3271 = vrot.lane.b32.xlu1 %v4948_v7, %s4439_s1 }
 0xec5   :  { %3195 = vrot.lane.b32.xlu0 %v4936_v50, %s4439_s1 }
 0xed6   :  { %v2701_v8 = vpop.xlane.xlu0 %2700 }
 0xed7   :  { %4385 = vrcp.f32 %v2701_v8 }
 0xede   :  { %v2704_v13 = vpop.xlane.xlu1 %2703 }
 0xedf   :  { %4387 = vrcp.f32 %v2704_v13 }
 0xee1   :  { %v4386_v14 = vpop.eup %4385 }
 0xee2   :  { %v2731_v3 = vmul.f32 %v4386_v14, %v5026_v4 }
 0xee4   :  { %4154 = vmatmul.mubr.msk.f32.vlgmr.msra.gmra.mrb[24].mxu0 %vm190_vm2, %v2731_v3 }
 0xee5   :  { %4162 = vmatpush3.msra.mxu0 %v2892_v5  ;;  %4163 = vmatprep.mubr.msk.f32.mxu0 %vm4434_vm1, %v4433_v43 }
 0xee6   :  { %4171 = vmatprep.subr.mxu0 %v4433_v43 }
 0xee9   :  { %v4388_v50 = vpop.eup %4387 }
 0xeea   :  { %v2732_v7 = vmul.f32 %v4388_v50, %v5030_v45 }
 0xeec   :  { %4159 = vmatmul.mubr.msk.f32.vlgmr.msra.gmra.mrb[34].mxu1 %vm190_vm2, %v2732_v7 }
 0xeed   :  { %4167 = vmatpush3.msra.mxu1 %v2968_v0  ;;  %4168 = vmatprep.mubr.msk.f32.mxu1 %vm4434_vm1, %v4433_v43 }
 0xeee   :  { %4176 = vmatprep.subr.mxu1 %v4433_v43 }
 0xf2f   :  { %v2710_v10 = vpop.xlane.xlu1 %2709 }
 0xf30   :  { %4389 = vrcp.f32 %v2710_v10 }
 0xf33   :  { %v2707_v15 = vpop.xlane.xlu0 %2706 }
 0xf34   :  { %4391 = vrcp.f32 %v2707_v15 }
 0xf37   :  { %v2716_v29 = vpop.xlane.xlu1 %2715 }
 0xf38   :  { %4393 = vrcp.f32 %v2716_v29  ;;  %v2713_v62 = vpop.xlane.xlu0 %2712  ;;  %v3468_v29 = vrot.slane %v4885_v36, %v1642_v61  ;;  %v3517_v61 = vrot.slane %v4898_v51, %v4537_v30  ;;  %v3832_v51 = vld [vmem:[%s5208_s4 + $0x20] sm:$0xff] }
 0xf39   :  { %4395 = vrcp.f32 %v2713_v62 }
 0xf3a   :  { %v4390_v16 = vpop.eup %4389 }
 0xf3b   :  { %v2734_v4 = vmul.f32 %v4390_v16, %v4374_v33  ;;  %v2722_v2 = vpop.xlane.xlu1 %2721  ;;  %v3827_v33 = vld [vmem:[%s5207_s3 + $0x28] sm:$0xff] }
 0xf3c   :  { %4397 = vrcp.f32 %v2722_v2  ;;  %v2719_v45 = vpop.xlane.xlu0 %2718  ;;  %v4280_v31 = vpack.c.bf16 %v3827_v33, %v3826_v32  ;;  %v3839_v32 = vld [vmem:[%s5209_s5 + $0x48] sm:$0xff]  ;;  %v3840_v33 = vld [vmem:[%s5209_s5 + $0x50] sm:$0xff] }
 0xf3d   :  { %4399 = vrcp.f32 %v2719_v45  ;;  %4169 = vmatmul.mubr.msk.f32.vlgmr.msra.gmra.mrb[36].mxu1 %vm190_vm2, %v2734_v4 }
 0xf3e   :  { %v4392_v48 = vpop.eup %4391  ;;  %4177 = vmatpush3.msra.mxu1 %v3120_v9  ;;  %4178 = vmatprep.mubr.msk.f32.mxu1 %vm4434_vm1, %v4433_v43 }
 0xf3f   :  { %v2733_v52 = vmul.f32 %v4392_v48, %v4376_v44  ;;  %4186 = vmatprep.subr.mxu1 %v4433_v43  ;;  %v3272_v19 = vpop.permute.xlu1 %3271 }
 0xf40   :  { %v3196_v21 = vpop.permute.xlu0 %3195 }
 0xf41   :  { %4164 = vmatmul.mubr.msk.f32.vlgmr.msra.gmra.mrb[26].mxu0 %vm190_vm2, %v2733_v52 }
 0xf42   :  { %v4394_v17 = vpop.eup %4393  ;;  %4172 = vmatpush3.msra.mxu0 %v3044_v1  ;;  %4173 = vmatprep.mubr.msk.f32.mxu0 %vm4434_vm1, %v4433_v43 }
 0xf43   :  { %v4396_v49 = vpop.eup %4395  ;;  %v2736_v47 = vmul.f32 %v4394_v17, %v4378_v53  ;;  %4181 = vmatprep.subr.mxu0 %v4433_v43 }
 0xf44   :  { %v2735_v18 = vmul.f32 %v4396_v49, %v4380_v55 }
 0xf45   :  { %4179 = vmatmul.mubr.msk.f32.vlgmr.msra.gmra.mrb[38].mxu1 %vm190_vm2, %v2736_v47 }
 0xf46   :  { %v4398_v20 = vpop.eup %4397  ;;  %4174 = vmatmul.mubr.msk.f32.vlgmr.msra.gmra.mrb[28].mxu0 %vm190_vm2, %v2735_v18  ;;  %4187 = vmatpush3.msra.mxu1 %v3272_v19 }
 0xf47   :  { %v4400_v22 = vpop.eup %4399  ;;  %v2738_v23 = vmul.f32 %v4398_v20, %v5040_v58  ;;  %4182 = vmatpush3.msra.mxu0 %v3196_v21  ;;  %4183 = vmatprep.mubr.msk.f32.mxu0 %vm4434_vm1, %v4433_v43 }
 0xf48   :  { %v2737_v41 = vmul.f32 %v4400_v22, %v5042_v59  ;;  %4188 = vmatprep.mubr.msk.f32.mxu1 %vm4434_vm1, %v4433_v43  ;;  %4281 = vmatprep.subr.bf16.mxu0 %v4280_v31  ;;  %v3828_v43 = vld [vmem:[%s5207_s3 + $0x30] sm:$0xff] }
 0xf49   :  { %4189 = vmatmul.mubr.msk.f32.vlgmr.msra.gmra.mrb[40].mxu1 %vm190_vm2, %v2738_v23  ;;  %v4284_v34 = vpack.c.bf16 %v3829_v39, %v3828_v43  ;;  %v3842_v39 = vld [vmem:[%s5209_s5 + $0x60] sm:$0xff] }
 0xf4a   :  { %4184 = vmatmul.mubr.msk.f32.vlgmr.msra.gmra.mrb[30].mxu0 %vm190_vm2, %v2737_v41  ;;  %v3833_v41 = vld [vmem:[%s5208_s4 + $0x28] sm:$0xff] }
 0xf4b   :  { %4283 = vmatpush3.bf16.msra.mxu0 %v4280_v31 }
 0xf4c   :  { %4285 = vmatprep.subr.bf16.mxu0 %v4284_v34 }
 0xf4f   :  { %4287 = vmatpush3.bf16.msra.mxu0 %v4284_v34 }
 0xfb7   :  { %v2811_v24 = vpop.f32.mrb[24].mxu0 }
 0xfb8   :  { %v4155_v27 = vpop.f32.mrb[25].mxu0 }
 0xfb9   :  { %v3834_v27 = vld [vmem:[%s5208_s4 + $0x30] sm:$0xff] }
 0xfbf   :  { %v2887_v25 = vpop.f32.mrb[34].mxu1 }
 0xfc0   :  { %v4160_v42 = vpop.f32.mrb[35].mxu1 }
 0xfc1   :  { %v3838_v42 = vld [vmem:[%s5209_s5 + $0x40] sm:$0xff] }
 0xfc2   :  { %v4296_v31 = vpack.c.bf16 %v3839_v32, %v3838_v42  ;;  %v3705_v42 = vld [vmem:[%s5212_s8] sm:$0x3]  ;;  %s4409_s8 = scalar_lea.vmem %s3752_s11, 256 }
 0xfc3   :  { %v3735_v32 = vrot.slane %v3705_v42, %v4529_v28  ;;  %p4410_p0 = scmp.ne.s32.totalorder %s3752_s11, %s4409_s8  ;;  %p4415_p2 = scmp.lt.s32.totalorder %s4409_s8, %s4409_s8 }
 0xfc4   :  { %4297 = vmatprep.subr.bf16.mxu0 %v4296_v31 }
 0xfc5   :  { %p4416_p3 = por %p4415_p2, %p4414_p1 }
 0xfc7   :  { %p4417_p4 = pnand %p4416_p3, %p4410_p0 }
0x1010   :  { %v3039_v35 = vpop.f32.mrb[36].mxu1 }
0x1011   :  { %v4170_v40 = vpop.f32.mrb[37].mxu1  ;;  %3363 = vrot.lane.b32.xlu0 %v3039_v35, %s4440_s18  ;;  %v3841_v35 = vld [vmem:[%s5209_s5 + $0x58] sm:$0xff] }
0x1012   :  { %v4300_v43 = vpack.c.bf16 %v3841_v35, %v3840_v33  ;;  %v3843_v40 = vld [vmem:[%s5209_s5 + $0x68] sm:$0xff] }
0x1013   :  { %v4304_v34 = vpack.c.bf16 %v3843_v40, %v3842_v39 }
0x1014   :  { %v2963_v44 = vpop.f32.mrb[26].mxu0 }
0x1015   :  { %3348 = vrot.lane.b32.xlu0 %v2963_v44, %s4440_s18  ;;  %v4165_v46 = vpop.f32.mrb[27].mxu0 }
0x1018   :  { %v3191_v53 = vpop.f32.mrb[38].mxu1 }
0x1019   :  { %v3115_v55 = vpop.f32.mrb[28].mxu0  ;;  %v4180_v56 = vpop.f32.mrb[39].mxu1  ;;  %3367 = vrot.lane.b32.xlu0 %v3191_v53, %s4441_s19 }
0x101a   :  { %3352 = vrot.lane.b32.xlu1 %v3115_v55, %s4441_s19  ;;  %v4175_v57 = vpop.f32.mrb[29].mxu0 }
0x101c   :  { %v3343_v58 = vpop.f32.mrb[40].mxu1 }
0x101d   :  { %v3267_v59 = vpop.f32.mrb[30].mxu0  ;;  %v4190_v60 = vpop.f32.mrb[41].mxu1 }
0x101e   :  { %3356 = vrot.lane.b32.xlu1 %v3267_v59, %s4442_s20  ;;  %v4185_v63 = vpop.f32.mrb[31].mxu0 }
0x101f   :  { %v3506_v63 = vrot.slane %v4885_v36, %v1680_v38 }
0x1022   :  { %3371 = vrot.lane.b32.xlu1 %v3343_v58, %s4442_s20  ;;  %v3500_v58 = vrot.slane %v4885_v36, %v1674_v37  ;;  %v3844_v37 = vld [vmem:[%s5209_s5 + $0x70] sm:$0xff] }
0x1083   :  { %v3364_v5 = vpop.permute.xlu0 %3363 }
0x1084   :  { %v3374_v50 = vsel %vm190_vm2, %v2887_v25, %v3364_v5  ;;  %v3835_v25 = vld [vmem:[%s5208_s4 + $0x38] sm:$0xff] }
0x1087   :  { %v3349_v1 = vpop.permute.xlu0 %3348 }
0x1088   :  { %v3359_v8 = vsel %vm190_vm2, %v2811_v24, %v3349_v1  ;;  %v4288_v24 = vpack.c.bf16 %v3833_v41, %v3832_v51 }
0x108a   :  { %4289 = vmatprep.subr.bf16.mxu1 %v4288_v24 }
0x108b   :  { %v3368_v14 = vpop.permute.xlu0 %3367  ;;  %4291 = vmatpush3.bf16.msra.mxu1 %v4288_v24 }
0x108c   :  { %v3353_v0 = vpop.permute.xlu1 %3352  ;;  %v3375_v7 = vsel %vm1534_vm5, %v3374_v50, %v3368_v14  ;;  %v3845_v14 = vld [vmem:[%s5209_s5 + $0x78] sm:$0xff] }
0x108d   :  { %v3360_v9 = vsel %vm1534_vm5, %v3359_v8, %v3353_v0 }
0x1090   :  { %v3357_v13 = vpop.permute.xlu1 %3356 }
0x1091   :  { %v3361_v3 = vsel %vm1536_vm6, %v3360_v9, %v3357_v13 }
0x1092   :  { %4199 = vmatprep.mubr.msk.f32.mxu0 %vm43_vm0, %v3361_v3  ;;  %v4308_v3 = vpack.c.bf16 %v3845_v14, %v3844_v37 }
0x1094   :  { %v3372_v10 = vpop.permute.xlu1 %3371 }
0x1095   :  { %v3376_v15 = vsel %vm1536_vm6, %v3375_v7, %v3372_v10 }
0x1096   :  { %4200 = vmatmul.mubr.msk.f32.vlgmr.msra.gmra.mrb[32].mxu0 %vm43_vm0, %v3376_v15 }
0x1097   :  { %4299 = vmatpush3.bf16.msra.mxu0 %v4296_v31 }
0x1098   :  { %4301 = vmatprep.subr.bf16.mxu0 %v4300_v43 }
0x109b   :  { %4303 = vmatpush3.bf16.msra.mxu0 %v4300_v43  ;;  %v3741_v43 = vrot.slane %v3705_v42, %v4537_v30 }
0x109c   :  { %4305 = vmatprep.subr.bf16.mxu0 %v4304_v34 }
0x109f   :  { %4307 = vmatpush3.bf16.msra.mxu0 %v4304_v34 }
0x10a0   :  { %4309 = vmatprep.subr.bf16.mxu0 %v4308_v3 }
0x10a3   :  { %4311 = vmatpush3.bf16.msra.mxu0 %v4308_v3 }
0x1169   :  { %v4201_v62 = vpop.f32.mrb[32].mxu0 }
0x116a   :  { %v3464_v16 = vadd.f32 %v4201_v62, %v4857_v11  ;;  %v3454_v4 = vpop.f32.mrb[33].mxu0 }
0x116b   :  { %v3463_v2 = vadd.f32 %v3454_v4, %v4859_v12 }
0x116c   :  { %v5111_v45 = vadd.f32 %v3468_v29, %v3464_v16 }
0x116d   :  { %v5113_v48 = vadd.f32 %v3468_v29, %v3463_v2  ;;  %v3702_v2 = vrot.slane %v4885_v36, %v1875_v6 }
0x116e   :  { %v3474_v52 = vsel %vm43_vm0, %v5111_v45, 0.0 }
0x116f   :  { %3475 = vadd.xlane.f32.xlu1 %v3474_v52  ;;  %v3471_v17 = vsel %vm43_vm0, %v5113_v48, 0.0 }
0x1170   :  { %3472 = vadd.xlane.f32.xlu0 %v3471_v17 }
0x1180   :  { %3520 = vrot.lane.b32.xlu1 %v3517_v61, %s4443_s17 }
0x11fc   :  { %v3476_v11 = vpop.xlane.xlu1 %3475 }
0x11fd   :  { %v3478_v49 = vmul.f32 0.03125, %v3476_v11  ;;  %v3473_v12 = vpop.xlane.xlu0 %3472 }
0x11fe   :  { %v3477_v47 = vmul.f32 0.03125, %v3473_v12 }
0x11ff   :  { %v3480_v18 = vsub.f32 %v5111_v45, %v3478_v49 }
0x1200   :  { %v3479_v19 = vsub.f32 %v5113_v48, %v3477_v47  ;;  %v3521_v38 = vpop.permute.xlu1 %3520 }
0x1201   :  { %v3482_v22 = vmul.f32 %v3480_v18, %v3480_v18 }
0x1202   :  { %v3481_v20 = vmul.f32 %v3479_v19, %v3479_v19 }
0x1203   :  { %v3486_v23 = vsel %vm43_vm0, %v3482_v22, 0.0 }
0x1204   :  { %v3483_v21 = vsel %vm43_vm0, %v3481_v20, 0.0 }
0x1205   :  { %3484 = vadd.xlane.f32.xlu0 %v3483_v21 }
0x1209   :  { %3487 = vadd.xlane.f32.xlu0 %v3486_v23 }
0x121f   :  { %3518 = vrot.lane.b32.xlu0 %v4902_v54, %s4443_s17  ;;  %v4292_v54 = vpack.c.bf16 %v3835_v25, %v3834_v27 }
0x1221   :  { %4293 = vmatprep.subr.bf16.mxu1 %v4292_v54 }
0x1222   :  { %4295 = vmatpush3.bf16.msra.mxu1 %v4292_v54 }
0x1292   :  { %v3485_v44 = vpop.xlane.xlu0 %3484 }
0x1293   :  { %v3489_v46 = vmul.f32 0.03125, %v3485_v44 }
0x1295   :  { %v3491_v53 = vadd.f32 1e-05, %v3489_v46 }
0x1296   :  { %v3488_v55 = vpop.xlane.xlu0 %3487 }
0x1297   :  { %4401 = vrsqrt.f32 %v3491_v53  ;;  %v3490_v56 = vmul.f32 0.03125, %v3488_v55 }
0x1299   :  { %v3492_v57 = vadd.f32 1e-05, %v3490_v56 }
0x129a   :  { %v3519_v50 = vpop.permute.xlu0 %3518 }
0x129b   :  { %4403 = vrsqrt.f32 %v3492_v57  ;;  %v3522_v7 = vsel %vm43_vm0, %v3519_v50, %v3521_v38 }
0x12a1   :  { %v4402_v59 = vpop.eup %4401 }
0x12a2   :  { %v3495_v60 = vmul.f32 %v4402_v59, %v3479_v19 }
0x12a4   :  { %v3501_v5 = vmul.f32 %v3500_v58, %v3495_v60 }
0x12a5   :  { %v4404_v1 = vpop.eup %4403 }
0x12a6   :  { %v3496_v0 = vmul.f32 %v4404_v1, %v3480_v18  ;;  %v3507_v8 = vadd.f32 %v3506_v63, %v3501_v5 }
0x12a8   :  { %v3502_v9 = vmul.f32 %v3500_v58, %v3496_v0  ;;  %4210 = vmatprep.mubr.msk.f32.mxu1 %vm43_vm0, %v3507_v8 }
0x12aa   :  { %v3508_v13 = vadd.f32 %v3506_v63, %v3502_v9 }
0x12ac   :  { %4211 = vmatmul.mubr.msk.f32.vlgmr.msra.gmra.mrb[42].mxu1 %vm43_vm0, %v3508_v13 }
0x137f   :  { %v4212_v10 = vpop.f32.mrb[42].mxu1 }
0x1380   :  { %v3602_v15 = vadd.f32 %v4212_v10, %v3522_v7  ;;  %v3596_v29 = vpop.f32.mrb[43].mxu1 }
0x1381   :  { %v3597_v62 = vadd.f32 %v3596_v29, %v3522_v7 }
0x1382   :  { %v3606_v4 = vmax.f32 %v3602_v15, 0.0 }
0x1383   :  { %v3605_v16 = vmax.f32 %v3597_v62, 0.0 }
0x1385   :  { %4229 = vmatprep.mubr.msk.f32.mxu0 %vm1789_vm7, %v3605_v16 }
0x1386   :  { %4230 = vmatmul.mubr.msk.f32.vlgmr.msra.gmra.mrb[34].mxu0 %vm1789_vm7, %v3606_v4 }
0x1459   :  { %v4231_v52 = vpop.f32.mrb[34].mxu0 }
0x145a   :  { %v3698_v17 = vadd.f32 %v4231_v52, %v5111_v45  ;;  %v3688_v61 = vpop.f32.mrb[35].mxu0 }
0x145b   :  { %v3697_v11 = vadd.f32 %v3688_v61, %v5113_v48 }
0x145c   :  { %v3704_v49 = vadd.f32 %v3702_v2, %v3698_v17 }
0x145d   :  { %v3703_v12 = vadd.f32 %v3702_v2, %v3697_v11 }
0x145e   :  { %v3709_v47 = vsel %vm43_vm0, %v3704_v49, 0.0 }
0x145f   :  { %3710 = vadd.xlane.f32.xlu0 %v3709_v47  ;;  %v3706_v18 = vsel %vm43_vm0, %v3703_v12, 0.0 }
0x1460   :  { %3707 = vadd.xlane.f32.xlu1 %v3706_v18 }
0x14ec   :  { %v3711_v19 = vpop.xlane.xlu0 %3710 }
0x14ed   :  { %v3713_v20 = vmul.f32 0.03125, %v3711_v19  ;;  %v3708_v21 = vpop.xlane.xlu1 %3707 }
0x14ee   :  { %v3712_v26 = vmul.f32 0.03125, %v3708_v21 }
0x14ef   :  { %v3715_v22 = vsub.f32 %v3704_v49, %v3713_v20 }
0x14f0   :  { %v3714_v6 = vsub.f32 %v3703_v12, %v3712_v26 }
0x14f1   :  { %v3717_v36 = vmul.f32 %v3715_v22, %v3715_v22 }
0x14f2   :  { %v3716_v23 = vmul.f32 %v3714_v6, %v3714_v6 }
0x14f3   :  { %v3721_v45 = vsel %vm43_vm0, %v3717_v36, 0.0 }
0x14f4   :  { %3722 = vadd.xlane.f32.xlu1 %v3721_v45  ;;  %v3718_v48 = vsel %vm43_vm0, %v3716_v23, 0.0 }
0x14f5   :  { %3719 = vadd.xlane.f32.xlu0 %v3718_v48 }
0x1581   :  { %v3723_v51 = vpop.xlane.xlu1 %3722 }
0x1582   :  { %v3725_v41 = vmul.f32 0.03125, %v3723_v51  ;;  %v3720_v24 = vpop.xlane.xlu0 %3719 }
0x1583   :  { %v3724_v27 = vmul.f32 0.03125, %v3720_v24 }
0x1584   :  { %v3727_v25 = vadd.f32 1e-05, %v3725_v41 }
0x1585   :  { %v3726_v54 = vadd.f32 1e-05, %v3724_v27 }
0x1586   :  { %4405 = vrsqrt.f32 %v3727_v25 }
0x1587   :  { %4407 = vrsqrt.f32 %v3726_v54 }
0x1590   :  { %v4406_v33 = vpop.eup %4405 }
0x1591   :  { %v4408_v31 = vpop.eup %4407  ;;  %v3731_v35 = vmul.f32 %v4406_v33, %v3715_v22 }
0x1592   :  { %v3730_v39 = vmul.f32 %v4408_v31, %v3714_v6 }
0x1593   :  { %v3737_v40 = vmul.f32 %v3735_v32, %v3731_v35 }
0x1594   :  { %v3736_v34 = vmul.f32 %v3735_v32, %v3730_v39 }
0x1595   :  { %v3743_v44 = vadd.f32 %v3741_v43, %v3737_v40 }
0x1596   :  { %v3742_v46 = vadd.f32 %v3741_v43, %v3736_v34 }
0x1597   :  { %3745 = vst.msk [vmem:[#allocation2 + $0x8] sm:$0xff] %vm43_vm0, %v3743_v44 }
0x1598   :  { %3744 = vst.msk [vmem:[#allocation2] sm:$0xff] %vm43_vm0, %v3742_v46 }
0x1599   :  { %4420 = shalt.err (!%p4417_p4)
}
0x159a   :  { %s4421_s20 = scalar_lea.hbm %s5213_s9, 256 }
0x159b   :  { %p4422_p5 = scmp.ne.s32.totalorder %s5213_s9, %s4421_s20  ;;  %p4425_p6 = scmp.lt.u32.totalorder %s4421_s20, %s5213_s9 }
0x159d   :  { %p4427_p7 = pnand %p4425_p6, %p4422_p5 }
0x159f   :  { %4430 = shalt.err (!%p4427_p7)
}
0x15a0   :  { %s4445_s15 = smov 128  }
0x15a1   :  { %3757 = dma.vmem_to_hbm [thread:$0]  %s3752_s11, 256, %s5213_s9, [#allocation3], %s4445_s15, %s4445_s15, %s4440_s18  }
0x15a2   :  { %4431 = dma.done.wait [#allocation3], 256  }
0x15a3   :  { %4432 = vsyncadd [#allocation3], 4294967040 }
0x15a4   :  { %3761 = vsyncpa [#allocation3], 1 }

</bundles_post_ra>
